<compile_context>
chip_gen: v6e
topology: v6e:2x2x1
jax: 0.10.0
libtpu: 0.0.40
codegen_flags: <defaults>
</compile_context>

<pallas_src>
import functools

import jax
import jax.numpy as jnp
from jax import lax
from jax.experimental import pallas as pl
from jax.experimental.pallas import tpu as pltpu


def _round_up(n, m):
    return ((n + m - 1) // m) * m


def _arnn_kernel(enc_ref, wcat_ref, h0_ref, wd_ref, bd_ref,
                 out_ref, hfinal_ref, h_scratch, hbuf_ref, *, seq_len):
    """One grid step = one batch block x one chunk of `ts` timesteps.

    Grid: (n_batch_blocks ['parallel'], n_time_chunks ['arbitrary', serial]).

    enc_ref:    (ts, bb, Hp)  precomputed encoder(x[t]) + b_e
    wcat_ref:   (Hp, 2*Hp)    fused, pre-transposed [W_r.T | W_f.T]
    h0_ref:     (bb, Hp)      initial hidden state (ones @ W_hi.T + b_hi)
    wd_ref:     (Hp, Op)      pre-transposed decoder weights
    bd_ref:     (8, Op)       decoder bias (row-replicated)
    out_ref:    (ts, bb, Op)  decoder output per timestep (fused epilogue)
    hfinal_ref: (bb, Hp)      hidden after the last real timestep
    h_scratch:  (bb, Hp)      recurrent state, resident across time chunks
    hbuf_ref:   (ts, bb, Hp)  per-chunk hidden states (feeds fused decoder)
    """
    c = pl.program_id(1)
    nc = pl.num_programs(1)
    ts, bb, hp = enc_ref.shape

    @pl.when(c == 0)
    def _():
        h_scratch[...] = h0_ref[...]

    wcat = wcat_ref[...]          # grid-invariant; loaded once per chunk

    def make_step(masked):
        def step(i, carry):
            h = h_scratch[...]
            # Fused forget + recurrent matmul: one MXU push on the serial chain.
            z = jnp.dot(h, wcat, preferred_element_type=jnp.float32)
            rec = z[:, :hp]
            forget = jax.nn.sigmoid(z[:, hp:])
            pre = enc_ref[i] + rec
            # Softsign.  TODO(synk): pre * pl.reciprocal(1+|pre|, approx=True)
            # (EUP slot) once the 1e-4 tolerance is relaxed.
            hidden_new = pre / (1.0 + jnp.abs(pre))
            # Blend rewritten as h + f*(hn - h): one fewer VALU op per step.
            h_next = h + forget * (hidden_new - h)
            if masked:
                # Only the last chunk can run past the real sequence length.
                h_next = jnp.where(c * ts + i < seq_len, h_next, h)
            h_scratch[...] = h_next
            hbuf_ref[i] = h_next
            return carry
        return step

    if seq_len % ts == 0:
        # Statically aligned: no tail mask anywhere.
        lax.fori_loop(0, ts, make_step(False), 0, unroll=True)
    else:
        @pl.when(c < nc - 1)
        def _():
            lax.fori_loop(0, ts, make_step(False), 0, unroll=True)

        @pl.when(c == nc - 1)
        def _():
            lax.fori_loop(0, ts, make_step(True), 0, unroll=True)

    # Fused decoder epilogue: one (ts*bb, Hp) @ (Hp, Op) GEMM per chunk so the
    # per-step hidden states never hit HBM.  (ts*bb merges leading dims only;
    # bb is a multiple of 8 and Hp of 128, so the reshape is layout-preserving.)
    h_all = hbuf_ref[...].reshape(ts * bb, hp)
    dec = jnp.dot(h_all, wd_ref[...], preferred_element_type=jnp.float32)
    dec = dec + bd_ref[0, :]
    out_ref[...] = dec.reshape(ts, bb, out_ref.shape[2])

    @pl.when(c == nc - 1)
    def _():
        hfinal_ref[...] = h_scratch[...]


def arnn_forward(x, params, *, ts=None, batch_block=None):
    """x: (batch, seq, n_input) float32. Returns (output, hidden) with
    output: (seq, batch, n_output), hidden: (batch, n_hidden)."""
    we, be, wr, wf, wd, bd, whi, bhi = params
    B, S, I = x.shape
    H = we.shape[0]
    O = wd.shape[0]

    # Time-chunk size: amortizes per-grid-step overhead (~0.35us) and the wcat
    # reload across many serial steps.
    # TODO(synk): tune per generation (~32-64 on v5e/v6e, ~16-32 on v7x)
    # against the VMEM budget.
    if ts is None:
        ts = 32
    ts = max(1, min(int(ts), S))
    n_chunks = -(-S // ts)
    Sp = n_chunks * ts

    # Batch blocking: leading 'parallel' grid axis (sharded across TensorCores
    # on multi-core parts such as v7x; pure loop on v5e/v6e).
    bb = _round_up(B, 8) if batch_block is None else _round_up(int(batch_block), 8)
    Bp = _round_up(B, bb)
    nb = Bp // bb

    Hp = _round_up(H, 128)
    Op = _round_up(O, 128)

    prec = jax.lax.Precision.HIGHEST

    # permute(1, 0, 2): (batch, seq, in) -> (seq, batch, in); pad time + batch
    # on the *small* input so the big encoder activation is produced already
    # padded (no extra pad/copy pass over the (Sp, Bp, Hp) tensor).
    x_t = jnp.transpose(x, (1, 0, 2)).astype(jnp.float32)
    x_p = jnp.pad(x_t, ((0, Sp - S), (0, Bp - B), (0, 0)))

    # Hoisted encoder: one MXU-friendly GEMM over all timesteps (plain XLA).
    # Weights zero-padded to Hp so padded hidden columns stay exactly zero.
    we_p = jnp.zeros((Hp, I), jnp.float32).at[:H, :].set(we)
    be_p = jnp.zeros((Hp,), jnp.float32).at[:H].set(be)
    enc_p = jnp.einsum('sbi,hi->sbh', x_p, we_p, precision=prec) + be_p

    # Fused + pre-transposed recurrent weights: [W_r.T | W_f.T], zero-padded.
    wcat_p = jnp.zeros((Hp, 2 * Hp), jnp.float32)
    wcat_p = wcat_p.at[:H, :H].set(wr.T).at[:H, Hp:Hp + H].set(wf.T)

    # Pre-transposed decoder weights / bias for the fused in-kernel epilogue.
    wd_p = jnp.zeros((Hp, Op), jnp.float32).at[:H, :O].set(wd.T)
    bd_p = jnp.zeros((8, Op), jnp.float32).at[:, :O].set(
        jnp.broadcast_to(bd, (8, O)))

    # Initial hidden = ones(B, 1) @ W_hi.T + b_hi (same row for every batch).
    h0_row = whi[:, 0] + bhi                                           # (H,)
    h0_p = jnp.zeros((Bp, Hp), jnp.float32).at[:, :H].set(
        jnp.broadcast_to(h0_row, (Bp, H)))

    # Explicit VMEM budget: double-buffered pipelined blocks + scratch, 2x headroom.
    f32b = 4
    blk_bytes = f32b * (2 * ts * bb * Hp          # enc
                        + 2 * ts * bb * Op        # out
                        + 2 * Hp * 2 * Hp         # wcat
                        + 2 * bb * Hp             # h0
                        + 2 * Hp * Op + 2 * 8 * Op  # wd, bd
                        + 2 * bb * Hp             # hfinal
                        + bb * Hp + ts * bb * Hp)  # scratches
    vmem_limit = int(min(max(2 * blk_bytes, 32 * 2**20), 96 * 2**20))

    out_p, hfinal_p = pl.pallas_call(
        functools.partial(_arnn_kernel, seq_len=S),
        out_shape=(
            jax.ShapeDtypeStruct((Sp, Bp, Op), jnp.float32),
            jax.ShapeDtypeStruct((Bp, Hp), jnp.float32),
        ),
        grid_spec=pltpu.PrefetchScalarGridSpec(
            num_scalar_prefetch=0,
            grid=(nb, n_chunks),
            in_specs=[
                pl.BlockSpec((ts, bb, Hp), lambda b, c: (c, b, 0)),    # enc
                pl.BlockSpec((Hp, 2 * Hp), lambda b, c: (0, 0)),       # wcat
                pl.BlockSpec((bb, Hp), lambda b, c: (b, 0)),           # h0
                pl.BlockSpec((Hp, Op), lambda b, c: (0, 0)),           # wd
                pl.BlockSpec((8, Op), lambda b, c: (0, 0)),            # bd
            ],
            out_specs=[
                pl.BlockSpec((ts, bb, Op), lambda b, c: (c, b, 0)),    # output
                pl.BlockSpec((bb, Hp), lambda b, c: (b, 0)),           # hfinal
            ],
            scratch_shapes=[
                pltpu.VMEM((bb, Hp), jnp.float32),        # recurrent state
                pltpu.VMEM((ts, bb, Hp), jnp.float32),    # per-chunk hiddens
            ],
        ),
        compiler_params=pltpu.CompilerParams(
            dimension_semantics=("parallel", "arbitrary"),
            vmem_limit_bytes=vmem_limit),
    )(enc_p, wcat_p, h0_p, wd_p, bd_p)

    out = out_p[:S, :B, :O]          # (S, B, O); padding cols were exact zeros
    hidden = hfinal_p[:B, :H]
    return out, hidden


def arnn_reference(x, params):
    """Pure-JAX reference mirroring the PyTorch forward."""
    we, be, wr, wf, wd, bd, whi, bhi = params
    prec = jax.lax.Precision.HIGHEST
    x_t = jnp.transpose(x, (1, 0, 2))
    B = x.shape[0]
    h = jnp.dot(jnp.ones((B, 1)), whi.T, precision=prec) + bhi

    def step(h, xt):
        forget = jax.nn.sigmoid(jnp.dot(h, wf.T, precision=prec))
        pre = (jnp.dot(xt, we.T, precision=prec) + be
               + jnp.dot(h, wr.T, precision=prec))
        hidden_new = pre / (1.0 + jnp.abs(pre))
        h = (1.0 - forget) * h + forget * hidden_new
        return h, jnp.dot(h, wd.T, precision=prec) + bd

    h_final, out = jax.lax.scan(step, h, x_t)
    return out, h_final


def make_params(key, n_input, n_hidden, n_output):
    ks = jax.random.split(key, 8)
    scale = 0.1
    we = scale * jax.random.normal(ks[0], (n_hidden, n_input), jnp.float32)
    be = scale * jax.random.normal(ks[1], (n_hidden,), jnp.float32)
    wr = scale * jax.random.normal(ks[2], (n_hidden, n_hidden), jnp.float32)
    wf = scale * jax.random.normal(ks[3], (n_hidden, n_hidden), jnp.float32)
    wd = scale * jax.random.normal(ks[4], (n_output, n_hidden), jnp.float32)
    bd = scale * jax.random.normal(ks[5], (n_output,), jnp.float32)
    whi = scale * jax.random.normal(ks[6], (n_hidden, 1), jnp.float32)
    bhi = scale * jax.random.normal(ks[7], (n_hidden,), jnp.float32)
    return we, be, wr, wf, wd, bd, whi, bhi


if __name__ == "__main__":
    # Small shapes consistent with the module's forward.  batch=12 exercises
    # two batch blocks when batch_block=8; the (ts, batch_block) sweep covers
    # the single-chunk, aligned-multi-chunk and masked-tail code paths.
    batch, seq, n_input, n_hidden, n_output = 12, 12, 8, 32, 4

    key = jax.random.PRNGKey(0)
    kx, kp = jax.random.split(key)
    x = jax.random.normal(kx, (batch, seq, n_input), jnp.float32)
    params = make_params(kp, n_input, n_hidden, n_output)

    out_want, hidden_want = arnn_reference(x, params)

    for ts, bb in ((None, None), (5, 8), (4, None)):
        out, hidden = arnn_forward(x, params, ts=ts, batch_block=bb)
        out = jax.block_until_ready(out)
        hidden = jax.block_until_ready(hidden)
        assert out.shape == (seq, batch, n_output)
        assert hidden.shape == (batch, n_hidden)
        assert jnp.allclose(out, out_want, atol=1e-4, rtol=1e-4), (ts, bb)
        assert jnp.allclose(hidden, hidden_want, atol=1e-4, rtol=1e-4), (ts, bb)

    print("KERNEL_OK")
</pallas_src>

<mosaic_0001>
module attributes {stable_mosaic.version = 11 : i64} {
  func.func @_arnn_kernel(%arg0: i32, %arg1: i32, %arg2: memref<12x16x128xf32, #tpu.memory_space<vmem>>, %arg3: memref<128x256xf32, #tpu.memory_space<vmem>>, %arg4: memref<16x128xf32, #tpu.memory_space<vmem>>, %arg5: memref<128x128xf32, #tpu.memory_space<vmem>>, %arg6: memref<8x128xf32, #tpu.memory_space<vmem>>, %arg7: memref<12x16x128xf32, #tpu.memory_space<vmem>>, %arg8: memref<16x128xf32, #tpu.memory_space<vmem>>, %arg9: memref<16x128xf32, #tpu.memory_space<vmem>>, %arg10: memref<12x16x128xf32, #tpu.memory_space<vmem>>) attributes {dimension_semantics = [#tpu.dimension_semantics<parallel>, #tpu.dimension_semantics<arbitrary>], iteration_bounds = array<i64: 1, 1>, scalar_prefetch = 0 : i64, scratch_operands = 2 : i64, tpu.core_type = #tpu.core_type<tc>, window_params = [{transform_indices = @transform_0, window_bounds = array<i64: 12, 16, 128>}, {pipeline_mode = #tpu.pipeline_mode<synchronous>, transform_indices = @transform_1, window_bounds = array<i64: 128, 256>}, {transform_indices = @transform_2, window_bounds = array<i64: 16, 128>}, {pipeline_mode = #tpu.pipeline_mode<synchronous>, transform_indices = @transform_3, window_bounds = array<i64: 128, 128>}, {pipeline_mode = #tpu.pipeline_mode<synchronous>, transform_indices = @transform_4, window_bounds = array<i64: 8, 128>}, {transform_indices = @transform_5, window_bounds = array<i64: 12, 16, 128>}, {transform_indices = @transform_6, window_bounds = array<i64: 16, 128>}]} {
    %c0_i32 = arith.constant 0 : i32
    %0 = arith.cmpi eq, %arg1, %c0_i32 : i32
    %1 = arith.extui %0 : i1 to i32
    %c0_i32_0 = arith.constant 0 : i32
    %2 = arith.cmpi ne, %1, %c0_i32_0 : i32
    scf.if %2 {
      %c0_147 = arith.constant 0 : index
      %c0_148 = arith.constant 0 : index
      %318 = vector.load %arg4[%c0_147, %c0_148] : memref<16x128xf32, #tpu.memory_space<vmem>>, vector<16x128xf32>
      %c0_149 = arith.constant 0 : index
      %c0_150 = arith.constant 0 : index
      %319 = vector.load %arg9[%c0_149, %c0_150] : memref<16x128xf32, #tpu.memory_space<vmem>>, vector<16x128xf32>
      tpu.vector_store %arg9[%c0_149, %c0_150], %318 {strides = array<i32>} : memref<16x128xf32, #tpu.memory_space<vmem>>, vector<16x128xf32>,
    } else {
    }
    %c0 = arith.constant 0 : index
    %c0_1 = arith.constant 0 : index
    %3 = vector.load %arg3[%c0, %c0_1] : memref<128x256xf32, #tpu.memory_space<vmem>>, vector<128x256xf32>
    %c0_i32_2 = arith.constant 0 : i32
    %c0_3 = arith.constant 0 : index
    %c0_4 = arith.constant 0 : index
    %4 = vector.load %arg9[%c0_3, %c0_4] : memref<16x128xf32, #tpu.memory_space<vmem>>, vector<16x128xf32>
    %cst = arith.constant dense<0.000000e+00> : vector<16x256xf32>
    %5 = tpu.matmul %4, %3, %cst {dimension_numbers = #tpu.dot_dimension_numbers<[1], [0], [0], [1], [0, 0, 1, 1], [], []>} : vector<16x128xf32>, vector<128x256xf32>, vector<16x256xf32> -> vector<16x256xf32>
    %6 = vector.extract_strided_slice %5 {offsets = [0, 0], sizes = [16, 128], strides = [1, 1]} : vector<16x256xf32> to vector<16x128xf32>
    %7 = vector.extract_strided_slice %5 {offsets = [0, 128], sizes = [16, 128], strides = [1, 1]} : vector<16x256xf32> to vector<16x128xf32>
    %8 = arith.negf %7 : vector<16x128xf32>
    %9 = math.exp %8 : vector<16x128xf32>
    %cst_5 = arith.constant 1.000000e+00 : f32
    %10 = vector.broadcast %cst_5 : f32 to vector<16x128xf32>
    %11 = arith.addf %10, %9 : vector<16x128xf32>
    %12 = arith.divf %10, %11 : vector<16x128xf32>
    %13 = arith.index_cast %c0_i32_2 : i32 to index
    %c0_6 = arith.constant 0 : index
    %c0_7 = arith.constant 0 : index
    %14 = vector.load %arg2[%13, %c0_6, %c0_7] : memref<12x16x128xf32, #tpu.memory_space<vmem>>, vector<1x16x128xf32>
    %15 = vector.shape_cast %14 : vector<1x16x128xf32> to vector<16x128xf32>
    %16 = arith.addf %15, %6 : vector<16x128xf32>
    %17 = math.absf %16 : vector<16x128xf32>
    %cst_8 = arith.constant 1.000000e+00 : f32
    %18 = vector.broadcast %cst_8 : f32 to vector<16x128xf32>
    %19 = arith.addf %18, %17 : vector<16x128xf32>
    %20 = arith.divf %16, %19 : vector<16x128xf32>
    %21 = arith.subf %20, %4 : vector<16x128xf32>
    %22 = arith.mulf %12, %21 : vector<16x128xf32>
    %23 = arith.addf %4, %22 : vector<16x128xf32>
    %c0_9 = arith.constant 0 : index
    %c0_10 = arith.constant 0 : index
    %24 = vector.load %arg9[%c0_9, %c0_10] : memref<16x128xf32, #tpu.memory_space<vmem>>, vector<16x128xf32>
    tpu.vector_store %arg9[%c0_9, %c0_10], %23 {strides = array<i32>} : memref<16x128xf32, #tpu.memory_space<vmem>>, vector<16x128xf32>,
    %25 = arith.index_cast %c0_i32_2 : i32 to index
    %c0_11 = arith.constant 0 : index
    %c0_12 = arith.constant 0 : index
    %26 = vector.load %arg10[%25, %c0_11, %c0_12] : memref<12x16x128xf32, #tpu.memory_space<vmem>>, vector<1x16x128xf32>
    %27 = vector.shape_cast %26 : vector<1x16x128xf32> to vector<16x128xf32>
    %28 = vector.shape_cast %23 : vector<16x128xf32> to vector<1x16x128xf32>
    tpu.vector_store %arg10[%25, %c0_11, %c0_12], %28 {strides = array<i32>} : memref<12x16x128xf32, #tpu.memory_space<vmem>>, vector<1x16x128xf32>,
    %c1_i32 = arith.constant 1 : i32
    %c0_13 = arith.constant 0 : index
    %c0_14 = arith.constant 0 : index
    %29 = vector.load %arg9[%c0_13, %c0_14] : memref<16x128xf32, #tpu.memory_space<vmem>>, vector<16x128xf32>
    %cst_15 = arith.constant dense<0.000000e+00> : vector<16x256xf32>
    %30 = tpu.matmul %29, %3, %cst_15 {dimension_numbers = #tpu.dot_dimension_numbers<[1], [0], [0], [1], [0, 0, 1, 1], [], []>} : vector<16x128xf32>, vector<128x256xf32>, vector<16x256xf32> -> vector<16x256xf32>
    %31 = vector.extract_strided_slice %30 {offsets = [0, 0], sizes = [16, 128], strides = [1, 1]} : vector<16x256xf32> to vector<16x128xf32>
    %32 = vector.extract_strided_slice %30 {offsets = [0, 128], sizes = [16, 128], strides = [1, 1]} : vector<16x256xf32> to vector<16x128xf32>
    %33 = arith.negf %32 : vector<16x128xf32>
    %34 = math.exp %33 : vector<16x128xf32>
    %cst_16 = arith.constant 1.000000e+00 : f32
    %35 = vector.broadcast %cst_16 : f32 to vector<16x128xf32>
    %36 = arith.addf %35, %34 : vector<16x128xf32>
    %37 = arith.divf %35, %36 : vector<16x128xf32>
    %38 = arith.index_cast %c1_i32 : i32 to index
    %c0_17 = arith.constant 0 : index
    %c0_18 = arith.constant 0 : index
    %39 = vector.load %arg2[%38, %c0_17, %c0_18] : memref<12x16x128xf32, #tpu.memory_space<vmem>>, vector<1x16x128xf32>
    %40 = vector.shape_cast %39 : vector<1x16x128xf32> to vector<16x128xf32>
    %41 = arith.addf %40, %31 : vector<16x128xf32>
    %42 = math.absf %41 : vector<16x128xf32>
    %cst_19 = arith.constant 1.000000e+00 : f32
    %43 = vector.broadcast %cst_19 : f32 to vector<16x128xf32>
    %44 = arith.addf %43, %42 : vector<16x128xf32>
    %45 = arith.divf %41, %44 : vector<16x128xf32>
    %46 = arith.subf %45, %29 : vector<16x128xf32>
    %47 = arith.mulf %37, %46 : vector<16x128xf32>
    %48 = arith.addf %29, %47 : vector<16x128xf32>
    %c0_20 = arith.constant 0 : index
    %c0_21 = arith.constant 0 : index
    %49 = vector.load %arg9[%c0_20, %c0_21] : memref<16x128xf32, #tpu.memory_space<vmem>>, vector<16x128xf32>
    tpu.vector_store %arg9[%c0_20, %c0_21], %48 {strides = array<i32>} : memref<16x128xf32, #tpu.memory_space<vmem>>, vector<16x128xf32>,
    %50 = arith.index_cast %c1_i32 : i32 to index
    %c0_22 = arith.constant 0 : index
    %c0_23 = arith.constant 0 : index
    %51 = vector.load %arg10[%50, %c0_22, %c0_23] : memref<12x16x128xf32, #tpu.memory_space<vmem>>, vector<1x16x128xf32>
    %52 = vector.shape_cast %51 : vector<1x16x128xf32> to vector<16x128xf32>
    %53 = vector.shape_cast %48 : vector<16x128xf32> to vector<1x16x128xf32>
    tpu.vector_store %arg10[%50, %c0_22, %c0_23], %53 {strides = array<i32>} : memref<12x16x128xf32, #tpu.memory_space<vmem>>, vector<1x16x128xf32>,
    %c2_i32 = arith.constant 2 : i32
    %c0_24 = arith.constant 0 : index
    %c0_25 = arith.constant 0 : index
    %54 = vector.load %arg9[%c0_24, %c0_25] : memref<16x128xf32, #tpu.memory_space<vmem>>, vector<16x128xf32>
    %cst_26 = arith.constant dense<0.000000e+00> : vector<16x256xf32>
    %55 = tpu.matmul %54, %3, %cst_26 {dimension_numbers = #tpu.dot_dimension_numbers<[1], [0], [0], [1], [0, 0, 1, 1], [], []>} : vector<16x128xf32>, vector<128x256xf32>, vector<16x256xf32> -> vector<16x256xf32>
    %56 = vector.extract_strided_slice %55 {offsets = [0, 0], sizes = [16, 128], strides = [1, 1]} : vector<16x256xf32> to vector<16x128xf32>
    %57 = vector.extract_strided_slice %55 {offsets = [0, 128], sizes = [16, 128], strides = [1, 1]} : vector<16x256xf32> to vector<16x128xf32>
    %58 = arith.negf %57 : vector<16x128xf32>
    %59 = math.exp %58 : vector<16x128xf32>
    %cst_27 = arith.constant 1.000000e+00 : f32
    %60 = vector.broadcast %cst_27 : f32 to vector<16x128xf32>
    %61 = arith.addf %60, %59 : vector<16x128xf32>
    %62 = arith.divf %60, %61 : vector<16x128xf32>
    %63 = arith.index_cast %c2_i32 : i32 to index
    %c0_28 = arith.constant 0 : index
    %c0_29 = arith.constant 0 : index
    %64 = vector.load %arg2[%63, %c0_28, %c0_29] : memref<12x16x128xf32, #tpu.memory_space<vmem>>, vector<1x16x128xf32>
    %65 = vector.shape_cast %64 : vector<1x16x128xf32> to vector<16x128xf32>
    %66 = arith.addf %65, %56 : vector<16x128xf32>
    %67 = math.absf %66 : vector<16x128xf32>
    %cst_30 = arith.constant 1.000000e+00 : f32
    %68 = vector.broadcast %cst_30 : f32 to vector<16x128xf32>
    %69 = arith.addf %68, %67 : vector<16x128xf32>
    %70 = arith.divf %66, %69 : vector<16x128xf32>
    %71 = arith.subf %70, %54 : vector<16x128xf32>
    %72 = arith.mulf %62, %71 : vector<16x128xf32>
    %73 = arith.addf %54, %72 : vector<16x128xf32>
    %c0_31 = arith.constant 0 : index
    %c0_32 = arith.constant 0 : index
    %74 = vector.load %arg9[%c0_31, %c0_32] : memref<16x128xf32, #tpu.memory_space<vmem>>, vector<16x128xf32>
    tpu.vector_store %arg9[%c0_31, %c0_32], %73 {strides = array<i32>} : memref<16x128xf32, #tpu.memory_space<vmem>>, vector<16x128xf32>,
    %75 = arith.index_cast %c2_i32 : i32 to index
    %c0_33 = arith.constant 0 : index
    %c0_34 = arith.constant 0 : index
    %76 = vector.load %arg10[%75, %c0_33, %c0_34] : memref<12x16x128xf32, #tpu.memory_space<vmem>>, vector<1x16x128xf32>
    %77 = vector.shape_cast %76 : vector<1x16x128xf32> to vector<16x128xf32>
    %78 = vector.shape_cast %73 : vector<16x128xf32> to vector<1x16x128xf32>
    tpu.vector_store %arg10[%75, %c0_33, %c0_34], %78 {strides = array<i32>} : memref<12x16x128xf32, #tpu.memory_space<vmem>>, vector<1x16x128xf32>,
    %c3_i32 = arith.constant 3 : i32
    %c0_35 = arith.constant 0 : index
    %c0_36 = arith.constant 0 : index
    %79 = vector.load %arg9[%c0_35, %c0_36] : memref<16x128xf32, #tpu.memory_space<vmem>>, vector<16x128xf32>
    %cst_37 = arith.constant dense<0.000000e+00> : vector<16x256xf32>
    %80 = tpu.matmul %79, %3, %cst_37 {dimension_numbers = #tpu.dot_dimension_numbers<[1], [0], [0], [1], [0, 0, 1, 1], [], []>} : vector<16x128xf32>, vector<128x256xf32>, vector<16x256xf32> -> vector<16x256xf32>
    %81 = vector.extract_strided_slice %80 {offsets = [0, 0], sizes = [16, 128], strides = [1, 1]} : vector<16x256xf32> to vector<16x128xf32>
    %82 = vector.extract_strided_slice %80 {offsets = [0, 128], sizes = [16, 128], strides = [1, 1]} : vector<16x256xf32> to vector<16x128xf32>
    %83 = arith.negf %82 : vector<16x128xf32>
    %84 = math.exp %83 : vector<16x128xf32>
    %cst_38 = arith.constant 1.000000e+00 : f32
    %85 = vector.broadcast %cst_38 : f32 to vector<16x128xf32>
    %86 = arith.addf %85, %84 : vector<16x128xf32>
    %87 = arith.divf %85, %86 : vector<16x128xf32>
    %88 = arith.index_cast %c3_i32 : i32 to index
    %c0_39 = arith.constant 0 : index
    %c0_40 = arith.constant 0 : index
    %89 = vector.load %arg2[%88, %c0_39, %c0_40] : memref<12x16x128xf32, #tpu.memory_space<vmem>>, vector<1x16x128xf32>
    %90 = vector.shape_cast %89 : vector<1x16x128xf32> to vector<16x128xf32>
    %91 = arith.addf %90, %81 : vector<16x128xf32>
    %92 = math.absf %91 : vector<16x128xf32>
    %cst_41 = arith.constant 1.000000e+00 : f32
    %93 = vector.broadcast %cst_41 : f32 to vector<16x128xf32>
    %94 = arith.addf %93, %92 : vector<16x128xf32>
    %95 = arith.divf %91, %94 : vector<16x128xf32>
    %96 = arith.subf %95, %79 : vector<16x128xf32>
    %97 = arith.mulf %87, %96 : vector<16x128xf32>
    %98 = arith.addf %79, %97 : vector<16x128xf32>
    %c0_42 = arith.constant 0 : index
    %c0_43 = arith.constant 0 : index
    %99 = vector.load %arg9[%c0_42, %c0_43] : memref<16x128xf32, #tpu.memory_space<vmem>>, vector<16x128xf32>
    tpu.vector_store %arg9[%c0_42, %c0_43], %98 {strides = array<i32>} : memref<16x128xf32, #tpu.memory_space<vmem>>, vector<16x128xf32>,
    %100 = arith.index_cast %c3_i32 : i32 to index
    %c0_44 = arith.constant 0 : index
    %c0_45 = arith.constant 0 : index
    %101 = vector.load %arg10[%100, %c0_44, %c0_45] : memref<12x16x128xf32, #tpu.memory_space<vmem>>, vector<1x16x128xf32>
    %102 = vector.shape_cast %101 : vector<1x16x128xf32> to vector<16x128xf32>
    %103 = vector.shape_cast %98 : vector<16x128xf32> to vector<1x16x128xf32>
    tpu.vector_store %arg10[%100, %c0_44, %c0_45], %103 {strides = array<i32>} : memref<12x16x128xf32, #tpu.memory_space<vmem>>, vector<1x16x128xf32>,
    %c4_i32 = arith.constant 4 : i32
    %c0_46 = arith.constant 0 : index
    %c0_47 = arith.constant 0 : index
    %104 = vector.load %arg9[%c0_46, %c0_47] : memref<16x128xf32, #tpu.memory_space<vmem>>, vector<16x128xf32>
    %cst_48 = arith.constant dense<0.000000e+00> : vector<16x256xf32>
    %105 = tpu.matmul %104, %3, %cst_48 {dimension_numbers = #tpu.dot_dimension_numbers<[1], [0], [0], [1], [0, 0, 1, 1], [], []>} : vector<16x128xf32>, vector<128x256xf32>, vector<16x256xf32> -> vector<16x256xf32>
    %106 = vector.extract_strided_slice %105 {offsets = [0, 0], sizes = [16, 128], strides = [1, 1]} : vector<16x256xf32> to vector<16x128xf32>
    %107 = vector.extract_strided_slice %105 {offsets = [0, 128], sizes = [16, 128], strides = [1, 1]} : vector<16x256xf32> to vector<16x128xf32>
    %108 = arith.negf %107 : vector<16x128xf32>
    %109 = math.exp %108 : vector<16x128xf32>
    %cst_49 = arith.constant 1.000000e+00 : f32
    %110 = vector.broadcast %cst_49 : f32 to vector<16x128xf32>
    %111 = arith.addf %110, %109 : vector<16x128xf32>
    %112 = arith.divf %110, %111 : vector<16x128xf32>
    %113 = arith.index_cast %c4_i32 : i32 to index
    %c0_50 = arith.constant 0 : index
    %c0_51 = arith.constant 0 : index
    %114 = vector.load %arg2[%113, %c0_50, %c0_51] : memref<12x16x128xf32, #tpu.memory_space<vmem>>, vector<1x16x128xf32>
    %115 = vector.shape_cast %114 : vector<1x16x128xf32> to vector<16x128xf32>
    %116 = arith.addf %115, %106 : vector<16x128xf32>
    %117 = math.absf %116 : vector<16x128xf32>
    %cst_52 = arith.constant 1.000000e+00 : f32
    %118 = vector.broadcast %cst_52 : f32 to vector<16x128xf32>
    %119 = arith.addf %118, %117 : vector<16x128xf32>
    %120 = arith.divf %116, %119 : vector<16x128xf32>
    %121 = arith.subf %120, %104 : vector<16x128xf32>
    %122 = arith.mulf %112, %121 : vector<16x128xf32>
    %123 = arith.addf %104, %122 : vector<16x128xf32>
    %c0_53 = arith.constant 0 : index
    %c0_54 = arith.constant 0 : index
    %124 = vector.load %arg9[%c0_53, %c0_54] : memref<16x128xf32, #tpu.memory_space<vmem>>, vector<16x128xf32>
    tpu.vector_store %arg9[%c0_53, %c0_54], %123 {strides = array<i32>} : memref<16x128xf32, #tpu.memory_space<vmem>>, vector<16x128xf32>,
    %125 = arith.index_cast %c4_i32 : i32 to index
    %c0_55 = arith.constant 0 : index
    %c0_56 = arith.constant 0 : index
    %126 = vector.load %arg10[%125, %c0_55, %c0_56] : memref<12x16x128xf32, #tpu.memory_space<vmem>>, vector<1x16x128xf32>
    %127 = vector.shape_cast %126 : vector<1x16x128xf32> to vector<16x128xf32>
    %128 = vector.shape_cast %123 : vector<16x128xf32> to vector<1x16x128xf32>
    tpu.vector_store %arg10[%125, %c0_55, %c0_56], %128 {strides = array<i32>} : memref<12x16x128xf32, #tpu.memory_space<vmem>>, vector<1x16x128xf32>,
    %c5_i32 = arith.constant 5 : i32
    %c0_57 = arith.constant 0 : index
    %c0_58 = arith.constant 0 : index
    %129 = vector.load %arg9[%c0_57, %c0_58] : memref<16x128xf32, #tpu.memory_space<vmem>>, vector<16x128xf32>
    %cst_59 = arith.constant dense<0.000000e+00> : vector<16x256xf32>
    %130 = tpu.matmul %129, %3, %cst_59 {dimension_numbers = #tpu.dot_dimension_numbers<[1], [0], [0], [1], [0, 0, 1, 1], [], []>} : vector<16x128xf32>, vector<128x256xf32>, vector<16x256xf32> -> vector<16x256xf32>
    %131 = vector.extract_strided_slice %130 {offsets = [0, 0], sizes = [16, 128], strides = [1, 1]} : vector<16x256xf32> to vector<16x128xf32>
    %132 = vector.extract_strided_slice %130 {offsets = [0, 128], sizes = [16, 128], strides = [1, 1]} : vector<16x256xf32> to vector<16x128xf32>
    %133 = arith.negf %132 : vector<16x128xf32>
    %134 = math.exp %133 : vector<16x128xf32>
    %cst_60 = arith.constant 1.000000e+00 : f32
    %135 = vector.broadcast %cst_60 : f32 to vector<16x128xf32>
    %136 = arith.addf %135, %134 : vector<16x128xf32>
    %137 = arith.divf %135, %136 : vector<16x128xf32>
    %138 = arith.index_cast %c5_i32 : i32 to index
    %c0_61 = arith.constant 0 : index
    %c0_62 = arith.constant 0 : index
    %139 = vector.load %arg2[%138, %c0_61, %c0_62] : memref<12x16x128xf32, #tpu.memory_space<vmem>>, vector<1x16x128xf32>
    %140 = vector.shape_cast %139 : vector<1x16x128xf32> to vector<16x128xf32>
    %141 = arith.addf %140, %131 : vector<16x128xf32>
    %142 = math.absf %141 : vector<16x128xf32>
    %cst_63 = arith.constant 1.000000e+00 : f32
    %143 = vector.broadcast %cst_63 : f32 to vector<16x128xf32>
    %144 = arith.addf %143, %142 : vector<16x128xf32>
    %145 = arith.divf %141, %144 : vector<16x128xf32>
    %146 = arith.subf %145, %129 : vector<16x128xf32>
    %147 = arith.mulf %137, %146 : vector<16x128xf32>
    %148 = arith.addf %129, %147 : vector<16x128xf32>
    %c0_64 = arith.constant 0 : index
    %c0_65 = arith.constant 0 : index
    %149 = vector.load %arg9[%c0_64, %c0_65] : memref<16x128xf32, #tpu.memory_space<vmem>>, vector<16x128xf32>
    tpu.vector_store %arg9[%c0_64, %c0_65], %148 {strides = array<i32>} : memref<16x128xf32, #tpu.memory_space<vmem>>, vector<16x128xf32>,
    %150 = arith.index_cast %c5_i32 : i32 to index
    %c0_66 = arith.constant 0 : index
    %c0_67 = arith.constant 0 : index
    %151 = vector.load %arg10[%150, %c0_66, %c0_67] : memref<12x16x128xf32, #tpu.memory_space<vmem>>, vector<1x16x128xf32>
    %152 = vector.shape_cast %151 : vector<1x16x128xf32> to vector<16x128xf32>
    %153 = vector.shape_cast %148 : vector<16x128xf32> to vector<1x16x128xf32>
    tpu.vector_store %arg10[%150, %c0_66, %c0_67], %153 {strides = array<i32>} : memref<12x16x128xf32, #tpu.memory_space<vmem>>, vector<1x16x128xf32>,
    %c6_i32 = arith.constant 6 : i32
    %c0_68 = arith.constant 0 : index
    %c0_69 = arith.constant 0 : index
    %154 = vector.load %arg9[%c0_68, %c0_69] : memref<16x128xf32, #tpu.memory_space<vmem>>, vector<16x128xf32>
    %cst_70 = arith.constant dense<0.000000e+00> : vector<16x256xf32>
    %155 = tpu.matmul %154, %3, %cst_70 {dimension_numbers = #tpu.dot_dimension_numbers<[1], [0], [0], [1], [0, 0, 1, 1], [], []>} : vector<16x128xf32>, vector<128x256xf32>, vector<16x256xf32> -> vector<16x256xf32>
    %156 = vector.extract_strided_slice %155 {offsets = [0, 0], sizes = [16, 128], strides = [1, 1]} : vector<16x256xf32> to vector<16x128xf32>
    %157 = vector.extract_strided_slice %155 {offsets = [0, 128], sizes = [16, 128], strides = [1, 1]} : vector<16x256xf32> to vector<16x128xf32>
    %158 = arith.negf %157 : vector<16x128xf32>
    %159 = math.exp %158 : vector<16x128xf32>
    %cst_71 = arith.constant 1.000000e+00 : f32
    %160 = vector.broadcast %cst_71 : f32 to vector<16x128xf32>
    %161 = arith.addf %160, %159 : vector<16x128xf32>
    %162 = arith.divf %160, %161 : vector<16x128xf32>
    %163 = arith.index_cast %c6_i32 : i32 to index
    %c0_72 = arith.constant 0 : index
    %c0_73 = arith.constant 0 : index
    %164 = vector.load %arg2[%163, %c0_72, %c0_73] : memref<12x16x128xf32, #tpu.memory_space<vmem>>, vector<1x16x128xf32>
    %165 = vector.shape_cast %164 : vector<1x16x128xf32> to vector<16x128xf32>
    %166 = arith.addf %165, %156 : vector<16x128xf32>
    %167 = math.absf %166 : vector<16x128xf32>
    %cst_74 = arith.constant 1.000000e+00 : f32
    %168 = vector.broadcast %cst_74 : f32 to vector<16x128xf32>
    %169 = arith.addf %168, %167 : vector<16x128xf32>
    %170 = arith.divf %166, %169 : vector<16x128xf32>
    %171 = arith.subf %170, %154 : vector<16x128xf32>
    %172 = arith.mulf %162, %171 : vector<16x128xf32>
    %173 = arith.addf %154, %172 : vector<16x128xf32>
    %c0_75 = arith.constant 0 : index
    %c0_76 = arith.constant 0 : index
    %174 = vector.load %arg9[%c0_75, %c0_76] : memref<16x128xf32, #tpu.memory_space<vmem>>, vector<16x128xf32>
    tpu.vector_store %arg9[%c0_75, %c0_76], %173 {strides = array<i32>} : memref<16x128xf32, #tpu.memory_space<vmem>>, vector<16x128xf32>,
    %175 = arith.index_cast %c6_i32 : i32 to index
    %c0_77 = arith.constant 0 : index
    %c0_78 = arith.constant 0 : index
    %176 = vector.load %arg10[%175, %c0_77, %c0_78] : memref<12x16x128xf32, #tpu.memory_space<vmem>>, vector<1x16x128xf32>
    %177 = vector.shape_cast %176 : vector<1x16x128xf32> to vector<16x128xf32>
    %178 = vector.shape_cast %173 : vector<16x128xf32> to vector<1x16x128xf32>
    tpu.vector_store %arg10[%175, %c0_77, %c0_78], %178 {strides = array<i32>} : memref<12x16x128xf32, #tpu.memory_space<vmem>>, vector<1x16x128xf32>,
    %c7_i32 = arith.constant 7 : i32
    %c0_79 = arith.constant 0 : index
    %c0_80 = arith.constant 0 : index
    %179 = vector.load %arg9[%c0_79, %c0_80] : memref<16x128xf32, #tpu.memory_space<vmem>>, vector<16x128xf32>
    %cst_81 = arith.constant dense<0.000000e+00> : vector<16x256xf32>
    %180 = tpu.matmul %179, %3, %cst_81 {dimension_numbers = #tpu.dot_dimension_numbers<[1], [0], [0], [1], [0, 0, 1, 1], [], []>} : vector<16x128xf32>, vector<128x256xf32>, vector<16x256xf32> -> vector<16x256xf32>
    %181 = vector.extract_strided_slice %180 {offsets = [0, 0], sizes = [16, 128], strides = [1, 1]} : vector<16x256xf32> to vector<16x128xf32>
    %182 = vector.extract_strided_slice %180 {offsets = [0, 128], sizes = [16, 128], strides = [1, 1]} : vector<16x256xf32> to vector<16x128xf32>
    %183 = arith.negf %182 : vector<16x128xf32>
    %184 = math.exp %183 : vector<16x128xf32>
    %cst_82 = arith.constant 1.000000e+00 : f32
    %185 = vector.broadcast %cst_82 : f32 to vector<16x128xf32>
    %186 = arith.addf %185, %184 : vector<16x128xf32>
    %187 = arith.divf %185, %186 : vector<16x128xf32>
    %188 = arith.index_cast %c7_i32 : i32 to index
    %c0_83 = arith.constant 0 : index
    %c0_84 = arith.constant 0 : index
    %189 = vector.load %arg2[%188, %c0_83, %c0_84] : memref<12x16x128xf32, #tpu.memory_space<vmem>>, vector<1x16x128xf32>
    %190 = vector.shape_cast %189 : vector<1x16x128xf32> to vector<16x128xf32>
    %191 = arith.addf %190, %181 : vector<16x128xf32>
    %192 = math.absf %191 : vector<16x128xf32>
    %cst_85 = arith.constant 1.000000e+00 : f32
    %193 = vector.broadcast %cst_85 : f32 to vector<16x128xf32>
    %194 = arith.addf %193, %192 : vector<16x128xf32>
    %195 = arith.divf %191, %194 : vector<16x128xf32>
    %196 = arith.subf %195, %179 : vector<16x128xf32>
    %197 = arith.mulf %187, %196 : vector<16x128xf32>
    %198 = arith.addf %179, %197 : vector<16x128xf32>
    %c0_86 = arith.constant 0 : index
    %c0_87 = arith.constant 0 : index
    %199 = vector.load %arg9[%c0_86, %c0_87] : memref<16x128xf32, #tpu.memory_space<vmem>>, vector<16x128xf32>
    tpu.vector_store %arg9[%c0_86, %c0_87], %198 {strides = array<i32>} : memref<16x128xf32, #tpu.memory_space<vmem>>, vector<16x128xf32>,
    %200 = arith.index_cast %c7_i32 : i32 to index
    %c0_88 = arith.constant 0 : index
    %c0_89 = arith.constant 0 : index
    %201 = vector.load %arg10[%200, %c0_88, %c0_89] : memref<12x16x128xf32, #tpu.memory_space<vmem>>, vector<1x16x128xf32>
    %202 = vector.shape_cast %201 : vector<1x16x128xf32> to vector<16x128xf32>
    %203 = vector.shape_cast %198 : vector<16x128xf32> to vector<1x16x128xf32>
    tpu.vector_store %arg10[%200, %c0_88, %c0_89], %203 {strides = array<i32>} : memref<12x16x128xf32, #tpu.memory_space<vmem>>, vector<1x16x128xf32>,
    %c8_i32 = arith.constant 8 : i32
    %c0_90 = arith.constant 0 : index
    %c0_91 = arith.constant 0 : index
    %204 = vector.load %arg9[%c0_90, %c0_91] : memref<16x128xf32, #tpu.memory_space<vmem>>, vector<16x128xf32>
    %cst_92 = arith.constant dense<0.000000e+00> : vector<16x256xf32>
    %205 = tpu.matmul %204, %3, %cst_92 {dimension_numbers = #tpu.dot_dimension_numbers<[1], [0], [0], [1], [0, 0, 1, 1], [], []>} : vector<16x128xf32>, vector<128x256xf32>, vector<16x256xf32> -> vector<16x256xf32>
    %206 = vector.extract_strided_slice %205 {offsets = [0, 0], sizes = [16, 128], strides = [1, 1]} : vector<16x256xf32> to vector<16x128xf32>
    %207 = vector.extract_strided_slice %205 {offsets = [0, 128], sizes = [16, 128], strides = [1, 1]} : vector<16x256xf32> to vector<16x128xf32>
    %208 = arith.negf %207 : vector<16x128xf32>
    %209 = math.exp %208 : vector<16x128xf32>
    %cst_93 = arith.constant 1.000000e+00 : f32
    %210 = vector.broadcast %cst_93 : f32 to vector<16x128xf32>
    %211 = arith.addf %210, %209 : vector<16x128xf32>
    %212 = arith.divf %210, %211 : vector<16x128xf32>
    %213 = arith.index_cast %c8_i32 : i32 to index
    %c0_94 = arith.constant 0 : index
    %c0_95 = arith.constant 0 : index
    %214 = vector.load %arg2[%213, %c0_94, %c0_95] : memref<12x16x128xf32, #tpu.memory_space<vmem>>, vector<1x16x128xf32>
    %215 = vector.shape_cast %214 : vector<1x16x128xf32> to vector<16x128xf32>
    %216 = arith.addf %215, %206 : vector<16x128xf32>
    %217 = math.absf %216 : vector<16x128xf32>
    %cst_96 = arith.constant 1.000000e+00 : f32
    %218 = vector.broadcast %cst_96 : f32 to vector<16x128xf32>
    %219 = arith.addf %218, %217 : vector<16x128xf32>
    %220 = arith.divf %216, %219 : vector<16x128xf32>
    %221 = arith.subf %220, %204 : vector<16x128xf32>
    %222 = arith.mulf %212, %221 : vector<16x128xf32>
    %223 = arith.addf %204, %222 : vector<16x128xf32>
    %c0_97 = arith.constant 0 : index
    %c0_98 = arith.constant 0 : index
    %224 = vector.load %arg9[%c0_97, %c0_98] : memref<16x128xf32, #tpu.memory_space<vmem>>, vector<16x128xf32>
    tpu.vector_store %arg9[%c0_97, %c0_98], %223 {strides = array<i32>} : memref<16x128xf32, #tpu.memory_space<vmem>>, vector<16x128xf32>,
    %225 = arith.index_cast %c8_i32 : i32 to index
    %c0_99 = arith.constant 0 : index
    %c0_100 = arith.constant 0 : index
    %226 = vector.load %arg10[%225, %c0_99, %c0_100] : memref<12x16x128xf32, #tpu.memory_space<vmem>>, vector<1x16x128xf32>
    %227 = vector.shape_cast %226 : vector<1x16x128xf32> to vector<16x128xf32>
    %228 = vector.shape_cast %223 : vector<16x128xf32> to vector<1x16x128xf32>
    tpu.vector_store %arg10[%225, %c0_99, %c0_100], %228 {strides = array<i32>} : memref<12x16x128xf32, #tpu.memory_space<vmem>>, vector<1x16x128xf32>,
    %c9_i32 = arith.constant 9 : i32
    %c0_101 = arith.constant 0 : index
    %c0_102 = arith.constant 0 : index
    %229 = vector.load %arg9[%c0_101, %c0_102] : memref<16x128xf32, #tpu.memory_space<vmem>>, vector<16x128xf32>
    %cst_103 = arith.constant dense<0.000000e+00> : vector<16x256xf32>
    %230 = tpu.matmul %229, %3, %cst_103 {dimension_numbers = #tpu.dot_dimension_numbers<[1], [0], [0], [1], [0, 0, 1, 1], [], []>} : vector<16x128xf32>, vector<128x256xf32>, vector<16x256xf32> -> vector<16x256xf32>
    %231 = vector.extract_strided_slice %230 {offsets = [0, 0], sizes = [16, 128], strides = [1, 1]} : vector<16x256xf32> to vector<16x128xf32>
    %232 = vector.extract_strided_slice %230 {offsets = [0, 128], sizes = [16, 128], strides = [1, 1]} : vector<16x256xf32> to vector<16x128xf32>
    %233 = arith.negf %232 : vector<16x128xf32>
    %234 = math.exp %233 : vector<16x128xf32>
    %cst_104 = arith.constant 1.000000e+00 : f32
    %235 = vector.broadcast %cst_104 : f32 to vector<16x128xf32>
    %236 = arith.addf %235, %234 : vector<16x128xf32>
    %237 = arith.divf %235, %236 : vector<16x128xf32>
    %238 = arith.index_cast %c9_i32 : i32 to index
    %c0_105 = arith.constant 0 : index
    %c0_106 = arith.constant 0 : index
    %239 = vector.load %arg2[%238, %c0_105, %c0_106] : memref<12x16x128xf32, #tpu.memory_space<vmem>>, vector<1x16x128xf32>
    %240 = vector.shape_cast %239 : vector<1x16x128xf32> to vector<16x128xf32>
    %241 = arith.addf %240, %231 : vector<16x128xf32>
    %242 = math.absf %241 : vector<16x128xf32>
    %cst_107 = arith.constant 1.000000e+00 : f32
    %243 = vector.broadcast %cst_107 : f32 to vector<16x128xf32>
    %244 = arith.addf %243, %242 : vector<16x128xf32>
    %245 = arith.divf %241, %244 : vector<16x128xf32>
    %246 = arith.subf %245, %229 : vector<16x128xf32>
    %247 = arith.mulf %237, %246 : vector<16x128xf32>
    %248 = arith.addf %229, %247 : vector<16x128xf32>
    %c0_108 = arith.constant 0 : index
    %c0_109 = arith.constant 0 : index
    %249 = vector.load %arg9[%c0_108, %c0_109] : memref<16x128xf32, #tpu.memory_space<vmem>>, vector<16x128xf32>
    tpu.vector_store %arg9[%c0_108, %c0_109], %248 {strides = array<i32>} : memref<16x128xf32, #tpu.memory_space<vmem>>, vector<16x128xf32>,
    %250 = arith.index_cast %c9_i32 : i32 to index
    %c0_110 = arith.constant 0 : index
    %c0_111 = arith.constant 0 : index
    %251 = vector.load %arg10[%250, %c0_110, %c0_111] : memref<12x16x128xf32, #tpu.memory_space<vmem>>, vector<1x16x128xf32>
    %252 = vector.shape_cast %251 : vector<1x16x128xf32> to vector<16x128xf32>
    %253 = vector.shape_cast %248 : vector<16x128xf32> to vector<1x16x128xf32>
    tpu.vector_store %arg10[%250, %c0_110, %c0_111], %253 {strides = array<i32>} : memref<12x16x128xf32, #tpu.memory_space<vmem>>, vector<1x16x128xf32>,
    %c10_i32 = arith.constant 10 : i32
    %c0_112 = arith.constant 0 : index
    %c0_113 = arith.constant 0 : index
    %254 = vector.load %arg9[%c0_112, %c0_113] : memref<16x128xf32, #tpu.memory_space<vmem>>, vector<16x128xf32>
    %cst_114 = arith.constant dense<0.000000e+00> : vector<16x256xf32>
    %255 = tpu.matmul %254, %3, %cst_114 {dimension_numbers = #tpu.dot_dimension_numbers<[1], [0], [0], [1], [0, 0, 1, 1], [], []>} : vector<16x128xf32>, vector<128x256xf32>, vector<16x256xf32> -> vector<16x256xf32>
    %256 = vector.extract_strided_slice %255 {offsets = [0, 0], sizes = [16, 128], strides = [1, 1]} : vector<16x256xf32> to vector<16x128xf32>
    %257 = vector.extract_strided_slice %255 {offsets = [0, 128], sizes = [16, 128], strides = [1, 1]} : vector<16x256xf32> to vector<16x128xf32>
    %258 = arith.negf %257 : vector<16x128xf32>
    %259 = math.exp %258 : vector<16x128xf32>
    %cst_115 = arith.constant 1.000000e+00 : f32
    %260 = vector.broadcast %cst_115 : f32 to vector<16x128xf32>
    %261 = arith.addf %260, %259 : vector<16x128xf32>
    %262 = arith.divf %260, %261 : vector<16x128xf32>
    %263 = arith.index_cast %c10_i32 : i32 to index
    %c0_116 = arith.constant 0 : index
    %c0_117 = arith.constant 0 : index
    %264 = vector.load %arg2[%263, %c0_116, %c0_117] : memref<12x16x128xf32, #tpu.memory_space<vmem>>, vector<1x16x128xf32>
    %265 = vector.shape_cast %264 : vector<1x16x128xf32> to vector<16x128xf32>
    %266 = arith.addf %265, %256 : vector<16x128xf32>
    %267 = math.absf %266 : vector<16x128xf32>
    %cst_118 = arith.constant 1.000000e+00 : f32
    %268 = vector.broadcast %cst_118 : f32 to vector<16x128xf32>
    %269 = arith.addf %268, %267 : vector<16x128xf32>
    %270 = arith.divf %266, %269 : vector<16x128xf32>
    %271 = arith.subf %270, %254 : vector<16x128xf32>
    %272 = arith.mulf %262, %271 : vector<16x128xf32>
    %273 = arith.addf %254, %272 : vector<16x128xf32>
    %c0_119 = arith.constant 0 : index
    %c0_120 = arith.constant 0 : index
    %274 = vector.load %arg9[%c0_119, %c0_120] : memref<16x128xf32, #tpu.memory_space<vmem>>, vector<16x128xf32>
    tpu.vector_store %arg9[%c0_119, %c0_120], %273 {strides = array<i32>} : memref<16x128xf32, #tpu.memory_space<vmem>>, vector<16x128xf32>,
    %275 = arith.index_cast %c10_i32 : i32 to index
    %c0_121 = arith.constant 0 : index
    %c0_122 = arith.constant 0 : index
    %276 = vector.load %arg10[%275, %c0_121, %c0_122] : memref<12x16x128xf32, #tpu.memory_space<vmem>>, vector<1x16x128xf32>
    %277 = vector.shape_cast %276 : vector<1x16x128xf32> to vector<16x128xf32>
    %278 = vector.shape_cast %273 : vector<16x128xf32> to vector<1x16x128xf32>
    tpu.vector_store %arg10[%275, %c0_121, %c0_122], %278 {strides = array<i32>} : memref<12x16x128xf32, #tpu.memory_space<vmem>>, vector<1x16x128xf32>,
    %c11_i32 = arith.constant 11 : i32
    %c0_123 = arith.constant 0 : index
    %c0_124 = arith.constant 0 : index
    %279 = vector.load %arg9[%c0_123, %c0_124] : memref<16x128xf32, #tpu.memory_space<vmem>>, vector<16x128xf32>
    %cst_125 = arith.constant dense<0.000000e+00> : vector<16x256xf32>
    %280 = tpu.matmul %279, %3, %cst_125 {dimension_numbers = #tpu.dot_dimension_numbers<[1], [0], [0], [1], [0, 0, 1, 1], [], []>} : vector<16x128xf32>, vector<128x256xf32>, vector<16x256xf32> -> vector<16x256xf32>
    %281 = vector.extract_strided_slice %280 {offsets = [0, 0], sizes = [16, 128], strides = [1, 1]} : vector<16x256xf32> to vector<16x128xf32>
    %282 = vector.extract_strided_slice %280 {offsets = [0, 128], sizes = [16, 128], strides = [1, 1]} : vector<16x256xf32> to vector<16x128xf32>
    %283 = arith.negf %282 : vector<16x128xf32>
    %284 = math.exp %283 : vector<16x128xf32>
    %cst_126 = arith.constant 1.000000e+00 : f32
    %285 = vector.broadcast %cst_126 : f32 to vector<16x128xf32>
    %286 = arith.addf %285, %284 : vector<16x128xf32>
    %287 = arith.divf %285, %286 : vector<16x128xf32>
    %288 = arith.index_cast %c11_i32 : i32 to index
    %c0_127 = arith.constant 0 : index
    %c0_128 = arith.constant 0 : index
    %289 = vector.load %arg2[%288, %c0_127, %c0_128] : memref<12x16x128xf32, #tpu.memory_space<vmem>>, vector<1x16x128xf32>
    %290 = vector.shape_cast %289 : vector<1x16x128xf32> to vector<16x128xf32>
    %291 = arith.addf %290, %281 : vector<16x128xf32>
    %292 = math.absf %291 : vector<16x128xf32>
    %cst_129 = arith.constant 1.000000e+00 : f32
    %293 = vector.broadcast %cst_129 : f32 to vector<16x128xf32>
    %294 = arith.addf %293, %292 : vector<16x128xf32>
    %295 = arith.divf %291, %294 : vector<16x128xf32>
    %296 = arith.subf %295, %279 : vector<16x128xf32>
    %297 = arith.mulf %287, %296 : vector<16x128xf32>
    %298 = arith.addf %279, %297 : vector<16x128xf32>
    %c0_130 = arith.constant 0 : index
    %c0_131 = arith.constant 0 : index
    %299 = vector.load %arg9[%c0_130, %c0_131] : memref<16x128xf32, #tpu.memory_space<vmem>>, vector<16x128xf32>
    tpu.vector_store %arg9[%c0_130, %c0_131], %298 {strides = array<i32>} : memref<16x128xf32, #tpu.memory_space<vmem>>, vector<16x128xf32>,
    %300 = arith.index_cast %c11_i32 : i32 to index
    %c0_132 = arith.constant 0 : index
    %c0_133 = arith.constant 0 : index
    %301 = vector.load %arg10[%300, %c0_132, %c0_133] : memref<12x16x128xf32, #tpu.memory_space<vmem>>, vector<1x16x128xf32>
    %302 = vector.shape_cast %301 : vector<1x16x128xf32> to vector<16x128xf32>
    %303 = vector.shape_cast %298 : vector<16x128xf32> to vector<1x16x128xf32>
    tpu.vector_store %arg10[%300, %c0_132, %c0_133], %303 {strides = array<i32>} : memref<12x16x128xf32, #tpu.memory_space<vmem>>, vector<1x16x128xf32>,
    %c12_i32 = arith.constant 12 : i32
    %c0_134 = arith.constant 0 : index
    %c0_135 = arith.constant 0 : index
    %c0_136 = arith.constant 0 : index
    %304 = vector.load %arg10[%c0_134, %c0_135, %c0_136] : memref<12x16x128xf32, #tpu.memory_space<vmem>>, vector<12x16x128xf32>
    %305 = vector.shape_cast %304 : vector<12x16x128xf32> to vector<192x128xf32>
    %c0_137 = arith.constant 0 : index
    %c0_138 = arith.constant 0 : index
    %306 = vector.load %arg5[%c0_137, %c0_138] : memref<128x128xf32, #tpu.memory_space<vmem>>, vector<128x128xf32>
    %cst_139 = arith.constant dense<0.000000e+00> : vector<192x128xf32>
    %307 = tpu.matmul %305, %306, %cst_139 {dimension_numbers = #tpu.dot_dimension_numbers<[1], [0], [0], [1], [0, 0, 1, 1], [], []>} : vector<192x128xf32>, vector<128x128xf32>, vector<192x128xf32> -> vector<192x128xf32>
    %c0_140 = arith.constant 0 : index
    %c0_141 = arith.constant 0 : index
    %308 = vector.load %arg6[%c0_140, %c0_141] : memref<8x128xf32, #tpu.memory_space<vmem>>, vector<1x128xf32>
    %309 = vector.shape_cast %308 : vector<1x128xf32> to vector<128xf32>
    %310 = vector.shape_cast %309 : vector<128xf32> to vector<1x128xf32>
    %311 = vector.broadcast %310 : vector<1x128xf32> to vector<192x128xf32>
    %312 = arith.addf %307, %311 : vector<192x128xf32>
    %313 = vector.shape_cast %312 : vector<192x128xf32> to vector<12x16x128xf32>
    %c0_142 = arith.constant 0 : index
    %c0_143 = arith.constant 0 : index
    %c0_144 = arith.constant 0 : index
    %314 = vector.load %arg7[%c0_142, %c0_143, %c0_144] : memref<12x16x128xf32, #tpu.memory_space<vmem>>, vector<12x16x128xf32>
    tpu.vector_store %arg7[%c0_142, %c0_143, %c0_144], %313 {strides = array<i32>} : memref<12x16x128xf32, #tpu.memory_space<vmem>>, vector<12x16x128xf32>,
    %c0_i32_145 = arith.constant 0 : i32
    %315 = arith.cmpi eq, %arg1, %c0_i32_145 : i32
    %316 = arith.extui %315 : i1 to i32
    %c0_i32_146 = arith.constant 0 : i32
    %317 = arith.cmpi ne, %316, %c0_i32_146 : i32
    scf.if %317 {
      %c0_147 = arith.constant 0 : index
      %c0_148 = arith.constant 0 : index
      %318 = vector.load %arg9[%c0_147, %c0_148] : memref<16x128xf32, #tpu.memory_space<vmem>>, vector<16x128xf32>
      %c0_149 = arith.constant 0 : index
      %c0_150 = arith.constant 0 : index
      %319 = vector.load %arg8[%c0_149, %c0_150] : memref<16x128xf32, #tpu.memory_space<vmem>>, vector<16x128xf32>
      tpu.vector_store %arg8[%c0_149, %c0_150], %318 {strides = array<i32>} : memref<16x128xf32, #tpu.memory_space<vmem>>, vector<16x128xf32>,
    } else {
    }
    return
  }
  func.func @transform_0(%arg0: i32, %arg1: i32) -> (i32, i32, i32) {
    %c0_i32 = arith.constant 0 : i32
    %c0_i32_0 = arith.constant 0 : i32
    return %arg1, %arg0, %c0_i32 : i32, i32, i32
  }
  func.func @transform_1(%arg0: i32, %arg1: i32) -> (i32, i32) {
    %c0_i32 = arith.constant 0 : i32
    %c0_i32_0 = arith.constant 0 : i32
    %c0_i32_1 = arith.constant 0 : i32
    return %c0_i32, %c0_i32_0 : i32, i32
  }
  func.func @transform_2(%arg0: i32, %arg1: i32) -> (i32, i32) {
    %c0_i32 = arith.constant 0 : i32
    %c0_i32_0 = arith.constant 0 : i32
    return %arg0, %c0_i32 : i32, i32
  }
  func.func @transform_3(%arg0: i32, %arg1: i32) -> (i32, i32) {
    %c0_i32 = arith.constant 0 : i32
    %c0_i32_0 = arith.constant 0 : i32
    %c0_i32_1 = arith.constant 0 : i32
    return %c0_i32, %c0_i32_0 : i32, i32
  }
  func.func @transform_4(%arg0: i32, %arg1: i32) -> (i32, i32) {
    %c0_i32 = arith.constant 0 : i32
    %c0_i32_0 = arith.constant 0 : i32
    %c0_i32_1 = arith.constant 0 : i32
    return %c0_i32, %c0_i32_0 : i32, i32
  }
  func.func @transform_5(%arg0: i32, %arg1: i32) -> (i32, i32, i32) {
    %c0_i32 = arith.constant 0 : i32
    %c0_i32_0 = arith.constant 0 : i32
    return %arg1, %arg0, %c0_i32 : i32, i32, i32
  }
  func.func @transform_6(%arg0: i32, %arg1: i32) -> (i32, i32) {
    %c0_i32 = arith.constant 0 : i32
    %c0_i32_0 = arith.constant 0 : i32
    return %arg0, %c0_i32 : i32, i32
  }
}

</mosaic_0001>

<bundles_post_ra>
// kernel: tpu_custom_call.1
= control target key start
LH: loop header
LB: loop body
LE: loop exit
PB: predicated region body
PF: predicated region fallthrough
CT: control target
= control target key end

     0   :  { %12 = vsyncpa [#allocation5], 0  ;;  %s3062_s0 = inlined_call_operand.hbm [shape: f32[12,16,128], index: 0, kind: input, shape index: {}]   ;;  %s3063_s1 = inlined_call_operand.hbm [shape: f32[128,256], index: 1, kind: input, shape index: {}]   ;;  %s3064_s2 = inlined_call_operand.hbm [shape: f32[16,128], index: 2, kind: input, shape index: {}]   ;;  %s3065_s3 = inlined_call_operand.hbm [shape: f32[128,128], index: 3, kind: input, shape index: {}]   ;;  %s3066_s4 = inlined_call_operand.hbm [shape: f32[8,128], index: 4, kind: input, shape index: {}]   ;;  %s3067_s5 = inlined_call_operand.hbm [shape: f32[12,16,128], index: 5, kind: output, shape index: {0}]   ;;  %s3068_s6 = inlined_call_operand.hbm [shape: f32[16,128], index: 6, kind: output, shape index: {1}]  }
   0x1   :  { %13 = vsyncpa [#allocation8], 0 }
   0x2   :  { %14 = vsyncpa [#allocation11], 0 }
   0x3   :  { %15 = vsyncpa [#allocation6], 0 }
   0x4   :  { %16 = vsyncpa [#allocation15], 0  ;;  %s2275_s21 = smov [#allocation7]  }
   0x5   :  { %s34_s22 = sshll.u32 %s2275_s21, 4  ;;  %s35_s22 = int_to_ptr.vmem [resolvable:$true] %s34_s22 }
   0x6   :  { %s2133_s23 = scalar_lea.vmem %s35_s22, 4096  ;;  %p2138_p1 = scmp.lt.s32.totalorder %s35_s22, %s35_s22 }
   0x7   :  { %p2134_p0 = scmp.ne.s32.totalorder %s35_s22, %s2133_s23  ;;  %p2139_p2 = scmp.lt.s32.totalorder %s2133_s23, %s2133_s23 }
   0x9   :  { %p2140_p3 = por %p2139_p2, %p2138_p1 }
   0xb   :  { %p2141_p4 = pnand %p2140_p3, %p2134_p0 }
   0xd   :  { %2144 = shalt.err (!%p2141_p4)
}
   0xe   :  { %s2276_s24 = smov 256   ;;  %s2277_s25 = smov 16  }
   0xf   :  { %40 = dma.hbm_to_vmem [thread:$0]  %s3063_s1, 4096, %s35_s22, [#allocation8], %s2276_s24, %s2276_s24, %s2277_s25  }
  0x10   :  { %s2278_s28 = smov [#allocation10]   ;;  %s2279_s30 = smov [#allocation4]  }
  0x11   :  { %s58_s29 = sshll.u32 %s2278_s28, 4  ;;  %s22_s7 = sshll.u32 %s2279_s30, 4  ;;  %s59_s29 = int_to_ptr.vmem [resolvable:$true] %s58_s29  ;;  %s23_s7 = int_to_ptr.vmem [resolvable:$true] %s22_s7 }
  0x12   :  { %s2153_s8 = scalar_lea.vmem %s59_s29, 2048  ;;  %p2158_p6 = scmp.lt.s32.totalorder %s59_s29, %s59_s29 }
  0x13   :  { %p2154_p5 = scmp.ne.s32.totalorder %s59_s29, %s2153_s8  ;;  %p2159_p7 = scmp.lt.s32.totalorder %s2153_s8, %s2153_s8 }
  0x15   :  { %p2160_p8 = por %p2159_p7, %p2158_p6 }
  0x17   :  { %p2161_p9 = pnand %p2160_p8, %p2154_p5 }
  0x19   :  { %2164 = shalt.err (!%p2161_p9)
}
  0x1a   :  { %s2280_s9 = smov 128   ;;  %s2281_s10 = smov 8  }
  0x1b   :  { %64 = dma.hbm_to_vmem [thread:$0]  %s3065_s3, 2048, %s59_s29, [#allocation11], %s2280_s9, %s2280_s9, %s2281_s10  }
  0x1c   :  { %s2173_s1 = scalar_lea.vmem %s23_s7, 3072  ;;  %p2178_p11 = scmp.lt.s32.totalorder %s23_s7, %s23_s7 }
  0x1d   :  { %p2174_p10 = scmp.ne.s32.totalorder %s23_s7, %s2173_s1  ;;  %p2179_p12 = scmp.lt.s32.totalorder %s2173_s1, %s2173_s1 }
  0x1f   :  { %p2180_p13 = por %p2179_p12, %p2178_p11 }
  0x21   :  { %p2181_p0 = pnand %p2180_p13, %p2174_p10 }
  0x23   :  { %2184 = shalt.err (!%p2181_p0)
}
  0x24   :  { %28 = dma.hbm_to_vmem [thread:$0]  %s3062_s0, 3072, %s23_s7, [#allocation5], %s2280_s9, %s2280_s9, %s2281_s10  }
  0x25   :  { %s2282_s15 = smov [#allocation9]   ;;  %s2283_s17 = smov [#allocation12]  }
  0x26   :  { %s46_s16 = sshll.u32 %s2282_s15, 4  ;;  %s71_s3 = sshll.u32 %s2283_s17, 4  ;;  %s47_s16 = int_to_ptr.vmem [resolvable:$true] %s46_s16  ;;  %s72_s3 = int_to_ptr.vmem [resolvable:$true] %s71_s3 }
  0x27   :  { %s2193_s18 = scalar_lea.vmem %s47_s16, 256  ;;  %p2198_p2 = scmp.lt.s32.totalorder %s47_s16, %s47_s16 }
  0x28   :  { %p2194_p1 = scmp.ne.s32.totalorder %s47_s16, %s2193_s18  ;;  %p2199_p3 = scmp.lt.s32.totalorder %s2193_s18, %s2193_s18 }
  0x2a   :  { %p2200_p4 = por %p2199_p3, %p2198_p2 }
  0x2c   :  { %p2201_p5 = pnand %p2200_p4, %p2194_p1 }
  0x2e   :  { %2204 = shalt.err (!%p2201_p5)
}
  0x2f   :  { %52 = dma.hbm_to_vmem [thread:$0]  %s3064_s2, 256, %s47_s16, [#allocation8], %s2280_s9, %s2280_s9, %s2281_s10  }
  0x30   :  { %s2213_s0 = scalar_lea.vmem %s72_s3, 128  ;;  %p2218_p7 = scmp.lt.s32.totalorder %s72_s3, %s72_s3 }
  0x31   :  { %p2214_p6 = scmp.ne.s32.totalorder %s72_s3, %s2213_s0  ;;  %p2219_p8 = scmp.lt.s32.totalorder %s2213_s0, %s2213_s0 }
  0x33   :  { %p2220_p9 = por %p2219_p8, %p2218_p7 }
  0x35   :  { %p2221_p10 = pnand %p2220_p9, %p2214_p6 }
  0x37   :  { %2224 = shalt.err (!%p2221_p10)
}
  0x38   :  { %74 = dma.hbm_to_vmem [thread:$0]  %s3066_s4, 128, %s72_s3, [#allocation11]  }
  0x39   :  { %2265 = dma.done.wait [#allocation5], 3072  }
  0x3a   :  { %2266 = vsyncadd [#allocation5], 4294964224 }
  0x3b   :  { %2267 = dma.done.wait [#allocation8], 4352  }
  0x3c   :  { %2268 = vsyncadd [#allocation8], 4294962944 }
  0x3d   :  { %2269 = dma.done.wait [#allocation11], 2176  }
  0x3e   :  { %2270 = vsyncadd [#allocation11], 4294965120  ;;  %v3069_v0 = vmov 0.0   ;;  %v2348_v1 = vld [vmem:[#allocation7 + $0xf8] sm:$0xff]  ;;  %v2350_v2 = vld [vmem:[#allocation7 + $0xf0] sm:$0xff]  ;;  %s2285_s2 = smov [#allocation14]  }
  0x3f   :  { %196 = vmatprep.mubr.f32.mxu1 %v3069_v0  ;;  %424 = vmatprep.mubr.f32.mxu0 %v3069_v0  ;;  %v2352_v3 = vld [vmem:[#allocation7 + $0xe8] sm:$0xff]  ;;  %v2355_v4 = vld [vmem:[#allocation7 + $0xe0] sm:$0xff]  ;;  %v2359_v5 = vld [vmem:[#allocation7 + $0xd8] sm:$0xff]  ;;  %s1786_s4 = sshll.u32 %s2285_s2, 4  ;;  %s1787_s4 = int_to_ptr.vmem [resolvable:$true] %s1786_s4 }
  0x40   :  { %132 = vmatprep.subr.mxu1 %v2348_v1  ;;  %360 = vmatprep.subr.mxu0 %v2348_v1  ;;  %v2363_v6 = vld [vmem:[#allocation7 + $0xd0] sm:$0xff]  ;;  %v2367_v7 = vld [vmem:[#allocation7 + $0xc8] sm:$0xff]  ;;  %v2371_v8 = vld [vmem:[#allocation7 + $0xc0] sm:$0xff]  ;;  %s2225_s23 = scalar_lea.vmem %s1787_s4, 256  ;;  %p2230_p12 = scmp.lt.s32.totalorder %s1787_s4, %s1787_s4 }
  0x41   :  { %133 = vmatpush1.msra.mxu1 %v2350_v2  ;;  %361 = vmatpush1.msra.mxu0 %v2350_v2  ;;  %v2375_v9 = vld [vmem:[#allocation7 + $0xb8] sm:$0xff]  ;;  %v2379_v10 = vld [vmem:[#allocation7 + $0xb0] sm:$0xff]  ;;  %v2383_v11 = vld [vmem:[#allocation7 + $0xa8] sm:$0xff]  ;;  %p2226_p11 = scmp.ne.s32.totalorder %s1787_s4, %s2225_s23  ;;  %p2231_p13 = scmp.lt.s32.totalorder %s2225_s23, %s2225_s23 }
  0x42   :  { %134 = vmatprep.subr.mxu1 %v2352_v3  ;;  %362 = vmatprep.subr.mxu0 %v2352_v3  ;;  %v2387_v12 = vld [vmem:[#allocation7 + $0xa0] sm:$0xff]  ;;  %v2391_v13 = vld [vmem:[#allocation7 + $0x98] sm:$0xff]  ;;  %v2395_v14 = vld [vmem:[#allocation7 + $0x90] sm:$0xff] }
  0x43   :  { %135 = vmatpush1.msra.mxu1 %v2355_v4  ;;  %363 = vmatpush1.msra.mxu0 %v2355_v4  ;;  %v2399_v15 = vld [vmem:[#allocation7 + $0x88] sm:$0xff]  ;;  %v2403_v16 = vld [vmem:[#allocation7 + $0x80] sm:$0xff]  ;;  %v2407_v17 = vld [vmem:[#allocation7 + $0x78] sm:$0xff]  ;;  %p2232_p0 = por %p2231_p13, %p2230_p12 }
  0x44   :  { %136 = vmatprep.subr.mxu1 %v2359_v5  ;;  %364 = vmatprep.subr.mxu0 %v2359_v5  ;;  %v2411_v18 = vld [vmem:[#allocation7 + $0x70] sm:$0xff]  ;;  %v2415_v19 = vld [vmem:[#allocation7 + $0x68] sm:$0xff]  ;;  %v2419_v20 = vld [vmem:[#allocation7 + $0x60] sm:$0xff] }
  0x45   :  { %137 = vmatpush1.msra.mxu1 %v2363_v6  ;;  %365 = vmatpush1.msra.mxu0 %v2363_v6  ;;  %v2423_v21 = vld [vmem:[#allocation7 + $0x58] sm:$0xff]  ;;  %v2427_v22 = vld [vmem:[#allocation7 + $0x50] sm:$0xff]  ;;  %v2431_v23 = vld [vmem:[#allocation7 + $0x48] sm:$0xff]  ;;  %p2233_p1 = pnand %p2232_p0, %p2226_p11 }
  0x46   :  { %138 = vmatprep.subr.mxu1 %v2367_v7  ;;  %366 = vmatprep.subr.mxu0 %v2367_v7  ;;  %v2435_v24 = vld [vmem:[#allocation7 + $0x40] sm:$0xff]  ;;  %v2439_v25 = vld [vmem:[#allocation7 + $0x38] sm:$0xff]  ;;  %v2443_v26 = vld [vmem:[#allocation7 + $0x30] sm:$0xff] }
  0x47   :  { %139 = vmatpush1.msra.mxu1 %v2371_v8  ;;  %367 = vmatpush1.msra.mxu0 %v2371_v8  ;;  %v2447_v27 = vld [vmem:[#allocation7 + $0x28] sm:$0xff]  ;;  %v2451_v28 = vld [vmem:[#allocation7 + $0x20] sm:$0xff]  ;;  %v2455_v29 = vld [vmem:[#allocation7 + $0x18] sm:$0xff] }
  0x48   :  { %140 = vmatprep.subr.mxu1 %v2375_v9  ;;  %368 = vmatprep.subr.mxu0 %v2375_v9  ;;  %v2459_v30 = vld [vmem:[#allocation7 + $0x10] sm:$0xff]  ;;  %v2463_v31 = vld [vmem:[#allocation7 + $0x8] sm:$0xff]  ;;  %v2467_v32 = vld [vmem:[#allocation7] sm:$0xff] }
  0x49   :  { %141 = vmatpush1.msra.mxu1 %v2379_v10  ;;  %369 = vmatpush1.msra.mxu0 %v2379_v10  ;;  %v2471_v33 = vld [vmem:[#allocation9] sm:$0xff]  ;;  %v2481_v34 = vld [vmem:[#allocation9 + $0x8] sm:$0xff] }
  0x4a   :  { %142 = vmatprep.subr.mxu1 %v2383_v11  ;;  %370 = vmatprep.subr.mxu0 %v2383_v11  ;;  %v221_v35 = vld [vmem:[#allocation4] sm:$0xff]  ;;  %v222_v39 = vld [vmem:[#allocation4 + $0x8] sm:$0xff] }
  0x4b   :  { %143 = vmatpush1.msra.mxu1 %v2387_v12  ;;  %371 = vmatpush1.msra.mxu0 %v2387_v12 }
  0x4c   :  { %144 = vmatprep.subr.mxu1 %v2391_v13  ;;  %372 = vmatprep.subr.mxu0 %v2391_v13 }
  0x4d   :  { %145 = vmatpush1.msra.mxu1 %v2395_v14  ;;  %373 = vmatpush1.msra.mxu0 %v2395_v14 }
  0x4e   :  { %146 = vmatprep.subr.mxu1 %v2399_v15  ;;  %374 = vmatprep.subr.mxu0 %v2399_v15 }
  0x4f   :  { %147 = vmatpush1.msra.mxu1 %v2403_v16  ;;  %375 = vmatpush1.msra.mxu0 %v2403_v16 }
  0x50   :  { %148 = vmatprep.subr.mxu1 %v2407_v17  ;;  %376 = vmatprep.subr.mxu0 %v2407_v17 }
  0x51   :  { %149 = vmatpush1.msra.mxu1 %v2411_v18  ;;  %377 = vmatpush1.msra.mxu0 %v2411_v18 }
  0x52   :  { %150 = vmatprep.subr.mxu1 %v2415_v19  ;;  %378 = vmatprep.subr.mxu0 %v2415_v19 }
  0x53   :  { %151 = vmatpush1.msra.mxu1 %v2419_v20  ;;  %379 = vmatpush1.msra.mxu0 %v2419_v20 }
  0x54   :  { %152 = vmatprep.subr.mxu1 %v2423_v21  ;;  %380 = vmatprep.subr.mxu0 %v2423_v21 }
  0x55   :  { %153 = vmatpush1.msra.mxu1 %v2427_v22  ;;  %381 = vmatpush1.msra.mxu0 %v2427_v22 }
  0x56   :  { %154 = vmatprep.subr.mxu1 %v2431_v23  ;;  %382 = vmatprep.subr.mxu0 %v2431_v23 }
  0x57   :  { %155 = vmatpush1.msra.mxu1 %v2435_v24  ;;  %383 = vmatpush1.msra.mxu0 %v2435_v24 }
  0x58   :  { %156 = vmatprep.subr.mxu1 %v2439_v25  ;;  %384 = vmatprep.subr.mxu0 %v2439_v25 }
  0x59   :  { %157 = vmatpush1.msra.mxu1 %v2443_v26  ;;  %385 = vmatpush1.msra.mxu0 %v2443_v26 }
  0x5a   :  { %158 = vmatprep.subr.mxu1 %v2447_v27  ;;  %386 = vmatprep.subr.mxu0 %v2447_v27 }
  0x5b   :  { %159 = vmatpush1.msra.mxu1 %v2451_v28  ;;  %387 = vmatpush1.msra.mxu0 %v2451_v28 }
  0x5c   :  { %160 = vmatprep.subr.mxu1 %v2455_v29  ;;  %388 = vmatprep.subr.mxu0 %v2455_v29 }
  0x5d   :  { %161 = vmatpush1.msra.mxu1 %v2459_v30  ;;  %389 = vmatpush1.msra.mxu0 %v2459_v30 }
  0x5e   :  { %162 = vmatprep.subr.mxu1 %v2463_v31  ;;  %390 = vmatprep.subr.mxu0 %v2463_v31 }
  0x5f   :  { %163 = vmatpush1.msra.mxu1 %v2467_v32  ;;  %391 = vmatpush1.msra.mxu0 %v2467_v32 }
  0x60   :  { %197 = vmatmul.mubr.f32.vlgmr.msra.gmra.mxu1 %v2471_v33  ;;  %245 = vmatprep.subr.mxu1 %v2348_v1 }
  0x61   :  { %202 = vmatprep.mubr.f32.mxu1 %v3069_v0  ;;  %246 = vmatpush1.msra.mxu1 %v2350_v2 }
  0x62   :  { %247 = vmatprep.subr.mxu1 %v2352_v3  ;;  %590 = vmatprep.subr.mxu0 %v2348_v1 }
  0x63   :  { %248 = vmatpush1.msra.mxu1 %v2355_v4 }
  0x64   :  { %203 = vmatmul.mubr.f32.gmra.mxu1 %v2481_v34  ;;  %249 = vmatprep.subr.mxu1 %v2359_v5 }
  0x65   :  { %250 = vmatpush1.msra.mxu1 %v2363_v6  ;;  %309 = vmatprep.mubr.f32.mxu1 %v3069_v0 }
  0x66   :  { %251 = vmatprep.subr.mxu1 %v2367_v7 }
  0x67   :  { %252 = vmatpush1.msra.mxu1 %v2371_v8 }
  0x68   :  { %253 = vmatprep.subr.mxu1 %v2375_v9 }
  0x69   :  { %254 = vmatpush1.msra.mxu1 %v2379_v10 }
  0x6a   :  { %255 = vmatprep.subr.mxu1 %v2383_v11 }
  0x6b   :  { %256 = vmatpush1.msra.mxu1 %v2387_v12 }
  0x6c   :  { %257 = vmatprep.subr.mxu1 %v2391_v13 }
  0x6d   :  { %258 = vmatpush1.msra.mxu1 %v2395_v14 }
  0x6e   :  { %259 = vmatprep.subr.mxu1 %v2399_v15 }
  0x6f   :  { %260 = vmatpush1.msra.mxu1 %v2403_v16 }
  0x70   :  { %261 = vmatprep.subr.mxu1 %v2407_v17 }
  0x71   :  { %262 = vmatpush1.msra.mxu1 %v2411_v18 }
  0x72   :  { %263 = vmatprep.subr.mxu1 %v2415_v19 }
  0x73   :  { %264 = vmatpush1.msra.mxu1 %v2419_v20 }
  0x74   :  { %265 = vmatprep.subr.mxu1 %v2423_v21 }
  0x75   :  { %266 = vmatpush1.msra.mxu1 %v2427_v22 }
  0x76   :  { %267 = vmatprep.subr.mxu1 %v2431_v23 }
  0x77   :  { %268 = vmatpush1.msra.mxu1 %v2435_v24 }
  0x78   :  { %269 = vmatprep.subr.mxu1 %v2439_v25 }
  0x79   :  { %270 = vmatpush1.msra.mxu1 %v2443_v26 }
  0x7a   :  { %271 = vmatprep.subr.mxu1 %v2447_v27 }
  0x7b   :  { %272 = vmatpush1.msra.mxu1 %v2451_v28 }
  0x7c   :  { %273 = vmatprep.subr.mxu1 %v2455_v29 }
  0x7d   :  { %274 = vmatpush1.msra.mxu1 %v2459_v30 }
  0x7e   :  { %275 = vmatprep.subr.mxu1 %v2463_v31 }
  0x7f   :  { %276 = vmatpush1.msra.mxu1 %v2467_v32 }
  0x80   :  { %475 = vmatprep.subr.mxu1 %v2348_v1 }
 0x120   :  { %v198_v36 = vpop.f32.mrf.mxu1 }
 0x121   :  { %v223_v37 = vadd.f32 %v221_v35, %v198_v36 }
 0x122   :  { %v200_v38 = vpop.f32.mrf.mxu1 }
 0x123   :  { %v1804_v40 = vmul.f32 -1.442695, %v200_v38  ;;  %v225_v42 = vand.u32 2147483647, %v223_v37  ;;  %v336_v38 = vld [vmem:[#allocation4 + $0x18] sm:$0xff] }
 0x124   :  { %v204_v41 = vpop.f32.mrf.mxu1 }
 0x125   :  { %1949 = vpow2.f32 %v1804_v40  ;;  %v224_v43 = vadd.f32 %v222_v39, %v204_v41  ;;  %v227_v46 = vadd.f32 1.0, %v225_v42 }
 0x126   :  { %v206_v44 = vpop.f32.mrf.mxu1 }
 0x127   :  { %v1805_v45 = vmul.f32 -1.442695, %v206_v44  ;;  %v226_v47 = vand.u32 2147483647, %v224_v43 }
 0x129   :  { %1951 = vpow2.f32 %v1805_v45  ;;  %v228_v48 = vadd.f32 1.0, %v226_v47 }
 0x12a   :  { %1953 = vrcp.f32 %v227_v46 }
 0x12b   :  { %1955 = vrcp.f32 %v228_v48 }
 0x132   :  { %v1950_v49 = vpop.eup %1949 }
 0x133   :  { %v215_v50 = vadd.f32 1.0, %v1950_v49 }
 0x135   :  { %1957 = vrcp.f32 %v215_v50 }
 0x136   :  { %v1952_v51 = vpop.eup %1951 }
 0x137   :  { %v216_v52 = vadd.f32 1.0, %v1952_v51  ;;  %v1954_v53 = vpop.eup %1953 }
 0x138   :  { %v230_v54 = vmul.f32 %v1954_v53, %v223_v37  ;;  %v1956_v55 = vpop.eup %1955 }
 0x139   :  { %1959 = vrcp.f32 %v216_v52  ;;  %v232_v57 = vmul.f32 %v1956_v55, %v224_v43 }
 0x13a   :  { %v233_v56 = vsub.f32 %v230_v54, %v2471_v33 }
 0x13b   :  { %v234_v60 = vsub.f32 %v232_v57, %v2481_v34 }
 0x142   :  { %v1958_v58 = vpop.eup %1957 }
 0x143   :  { %v235_v59 = vmul.f32 %v1958_v58, %v233_v56 }
 0x145   :  { %v2521_v61 = vadd.f32 %v235_v59, %v2471_v33  ;;  %v335_v33 = vld [vmem:[#allocation4 + $0x10] sm:$0xff] }
 0x146   :  { %v1960_v62 = vpop.eup %1959 }
 0x147   :  { %310 = vmatmul.mubr.f32.vlgmr.msra.gmra.mxu1 %v2521_v61  ;;  %v236_v63 = vmul.f32 %v1960_v62, %v234_v60 }
 0x148   :  { %315 = vmatprep.mubr.f32.mxu1 %v3069_v0  ;;  %476 = vmatpush1.msra.mxu1 %v2350_v2 }
 0x149   :  { %v2527_v35 = vadd.f32 %v236_v63, %v2481_v34  ;;  %477 = vmatprep.subr.mxu1 %v2352_v3 }
 0x14a   :  { %478 = vmatpush1.msra.mxu1 %v2355_v4 }
 0x14b   :  { %316 = vmatmul.mubr.f32.gmra.mxu1 %v2527_v35  ;;  %479 = vmatprep.subr.mxu1 %v2359_v5 }
 0x14c   :  { %480 = vmatpush1.msra.mxu1 %v2363_v6  ;;  %539 = vmatprep.mubr.f32.mxu1 %v3069_v0 }
 0x14d   :  { %481 = vmatprep.subr.mxu1 %v2367_v7 }
 0x14e   :  { %482 = vmatpush1.msra.mxu1 %v2371_v8 }
 0x14f   :  { %483 = vmatprep.subr.mxu1 %v2375_v9 }
 0x150   :  { %484 = vmatpush1.msra.mxu1 %v2379_v10 }
 0x151   :  { %485 = vmatprep.subr.mxu1 %v2383_v11 }
 0x152   :  { %486 = vmatpush1.msra.mxu1 %v2387_v12 }
 0x153   :  { %487 = vmatprep.subr.mxu1 %v2391_v13 }
 0x154   :  { %488 = vmatpush1.msra.mxu1 %v2395_v14 }
 0x155   :  { %489 = vmatprep.subr.mxu1 %v2399_v15 }
 0x156   :  { %490 = vmatpush1.msra.mxu1 %v2403_v16 }
 0x157   :  { %491 = vmatprep.subr.mxu1 %v2407_v17 }
 0x158   :  { %492 = vmatpush1.msra.mxu1 %v2411_v18 }
 0x159   :  { %493 = vmatprep.subr.mxu1 %v2415_v19 }
 0x15a   :  { %494 = vmatpush1.msra.mxu1 %v2419_v20 }
 0x15b   :  { %495 = vmatprep.subr.mxu1 %v2423_v21 }
 0x15c   :  { %496 = vmatpush1.msra.mxu1 %v2427_v22 }
 0x15d   :  { %497 = vmatprep.subr.mxu1 %v2431_v23 }
 0x15e   :  { %498 = vmatpush1.msra.mxu1 %v2435_v24 }
 0x15f   :  { %499 = vmatprep.subr.mxu1 %v2439_v25 }
 0x160   :  { %500 = vmatpush1.msra.mxu1 %v2443_v26 }
 0x161   :  { %501 = vmatprep.subr.mxu1 %v2447_v27 }
 0x162   :  { %502 = vmatpush1.msra.mxu1 %v2451_v28 }
 0x163   :  { %503 = vmatprep.subr.mxu1 %v2455_v29 }
 0x164   :  { %504 = vmatpush1.msra.mxu1 %v2459_v30 }
 0x165   :  { %505 = vmatprep.subr.mxu1 %v2463_v31 }
 0x166   :  { %506 = vmatpush1.msra.mxu1 %v2467_v32 }
 0x167   :  { %705 = vmatprep.subr.mxu1 %v2348_v1 }
 0x207   :  { %v311_v34 = vpop.f32.mrf.mxu1 }
 0x208   :  { %v337_v36 = vadd.f32 %v335_v33, %v311_v34  ;;  %v450_v34 = vld [vmem:[#allocation4 + $0x20] sm:$0xff] }
 0x209   :  { %v313_v37 = vpop.f32.mrf.mxu1 }
 0x20a   :  { %v1806_v39 = vmul.f32 -1.442695, %v313_v37  ;;  %v339_v41 = vand.u32 2147483647, %v337_v36 }
 0x20b   :  { %v317_v40 = vpop.f32.mrf.mxu1 }
 0x20c   :  { %1961 = vpow2.f32 %v1806_v39  ;;  %v338_v42 = vadd.f32 %v336_v38, %v317_v40  ;;  %v341_v45 = vadd.f32 1.0, %v339_v41  ;;  %v451_v39 = vld [vmem:[#allocation4 + $0x28] sm:$0xff] }
 0x20d   :  { %v319_v43 = vpop.f32.mrf.mxu1 }
 0x20e   :  { %v1807_v44 = vmul.f32 -1.442695, %v319_v43  ;;  %v340_v46 = vand.u32 2147483647, %v338_v42 }
 0x210   :  { %1963 = vpow2.f32 %v1807_v44  ;;  %v342_v47 = vadd.f32 1.0, %v340_v46 }
 0x211   :  { %1965 = vrcp.f32 %v341_v45 }
 0x212   :  { %1967 = vrcp.f32 %v342_v47 }
 0x219   :  { %v1962_v48 = vpop.eup %1961 }
 0x21a   :  { %v328_v49 = vadd.f32 1.0, %v1962_v48 }
 0x21c   :  { %1969 = vrcp.f32 %v328_v49 }
 0x21d   :  { %v1964_v50 = vpop.eup %1963 }
 0x21e   :  { %v329_v51 = vadd.f32 1.0, %v1964_v50  ;;  %v1966_v52 = vpop.eup %1965 }
 0x21f   :  { %v344_v53 = vmul.f32 %v1966_v52, %v337_v36  ;;  %v1968_v54 = vpop.eup %1967 }
 0x220   :  { %1971 = vrcp.f32 %v329_v51  ;;  %v346_v56 = vmul.f32 %v1968_v54, %v338_v42 }
 0x221   :  { %v347_v55 = vsub.f32 %v344_v53, %v2521_v61 }
 0x222   :  { %v348_v59 = vsub.f32 %v346_v56, %v2527_v35 }
 0x229   :  { %v1970_v57 = vpop.eup %1969 }
 0x22a   :  { %v349_v58 = vmul.f32 %v1970_v57, %v347_v55 }
 0x22c   :  { %v2565_v60 = vadd.f32 %v349_v58, %v2521_v61 }
 0x22d   :  { %v1972_v62 = vpop.eup %1971 }
 0x22e   :  { %425 = vmatmul.mubr.f32.vlgmr.msra.gmra.mxu0 %v2565_v60  ;;  %v350_v63 = vmul.f32 %v1972_v62, %v348_v59 }
 0x22f   :  { %430 = vmatprep.mubr.f32.mxu0 %v3069_v0  ;;  %591 = vmatpush1.msra.mxu0 %v2350_v2 }
 0x230   :  { %v2571_v33 = vadd.f32 %v350_v63, %v2527_v35  ;;  %592 = vmatprep.subr.mxu0 %v2352_v3 }
 0x231   :  { %593 = vmatpush1.msra.mxu0 %v2355_v4 }
 0x232   :  { %431 = vmatmul.mubr.f32.gmra.mxu0 %v2571_v33  ;;  %594 = vmatprep.subr.mxu0 %v2359_v5 }
 0x233   :  { %595 = vmatpush1.msra.mxu0 %v2363_v6  ;;  %654 = vmatprep.mubr.f32.mxu0 %v3069_v0 }
 0x234   :  { %596 = vmatprep.subr.mxu0 %v2367_v7 }
 0x235   :  { %597 = vmatpush1.msra.mxu0 %v2371_v8 }
 0x236   :  { %598 = vmatprep.subr.mxu0 %v2375_v9 }
 0x237   :  { %599 = vmatpush1.msra.mxu0 %v2379_v10 }
 0x238   :  { %600 = vmatprep.subr.mxu0 %v2383_v11 }
 0x239   :  { %601 = vmatpush1.msra.mxu0 %v2387_v12 }
 0x23a   :  { %602 = vmatprep.subr.mxu0 %v2391_v13 }
 0x23b   :  { %603 = vmatpush1.msra.mxu0 %v2395_v14 }
 0x23c   :  { %604 = vmatprep.subr.mxu0 %v2399_v15 }
 0x23d   :  { %605 = vmatpush1.msra.mxu0 %v2403_v16 }
 0x23e   :  { %606 = vmatprep.subr.mxu0 %v2407_v17 }
 0x23f   :  { %607 = vmatpush1.msra.mxu0 %v2411_v18 }
 0x240   :  { %608 = vmatprep.subr.mxu0 %v2415_v19 }
 0x241   :  { %609 = vmatpush1.msra.mxu0 %v2419_v20 }
 0x242   :  { %610 = vmatprep.subr.mxu0 %v2423_v21 }
 0x243   :  { %611 = vmatpush1.msra.mxu0 %v2427_v22 }
 0x244   :  { %612 = vmatprep.subr.mxu0 %v2431_v23 }
 0x245   :  { %613 = vmatpush1.msra.mxu0 %v2435_v24 }
 0x246   :  { %614 = vmatprep.subr.mxu0 %v2439_v25 }
 0x247   :  { %615 = vmatpush1.msra.mxu0 %v2443_v26 }
 0x248   :  { %616 = vmatprep.subr.mxu0 %v2447_v27 }
 0x249   :  { %617 = vmatpush1.msra.mxu0 %v2451_v28 }
 0x24a   :  { %618 = vmatprep.subr.mxu0 %v2455_v29 }
 0x24b   :  { %619 = vmatpush1.msra.mxu0 %v2459_v30 }
 0x24c   :  { %620 = vmatprep.subr.mxu0 %v2463_v31 }
 0x24d   :  { %621 = vmatpush1.msra.mxu0 %v2467_v32 }
 0x24e   :  { %820 = vmatprep.subr.mxu0 %v2348_v1 }
 0x2ee   :  { %v426_v36 = vpop.f32.mrf.mxu0 }
 0x2ef   :  { %v452_v37 = vadd.f32 %v450_v34, %v426_v36 }
 0x2f0   :  { %v428_v38 = vpop.f32.mrf.mxu0 }
 0x2f1   :  { %v1808_v40 = vmul.f32 -1.442695, %v428_v38  ;;  %v454_v42 = vand.u32 2147483647, %v452_v37  ;;  %v565_v38 = vld [vmem:[#allocation4 + $0x30] sm:$0xff] }
 0x2f2   :  { %v432_v41 = vpop.f32.mrf.mxu0 }
 0x2f3   :  { %1973 = vpow2.f32 %v1808_v40  ;;  %v453_v43 = vadd.f32 %v451_v39, %v432_v41  ;;  %v456_v46 = vadd.f32 1.0, %v454_v42  ;;  %v566_v42 = vld [vmem:[#allocation4 + $0x38] sm:$0xff] }
 0x2f4   :  { %v434_v44 = vpop.f32.mrf.mxu0 }
 0x2f5   :  { %v1809_v45 = vmul.f32 -1.442695, %v434_v44  ;;  %v455_v47 = vand.u32 2147483647, %v453_v43 }
 0x2f7   :  { %1975 = vpow2.f32 %v1809_v45  ;;  %v457_v48 = vadd.f32 1.0, %v455_v47 }
 0x2f8   :  { %1977 = vrcp.f32 %v456_v46 }
 0x2f9   :  { %1979 = vrcp.f32 %v457_v48 }
 0x300   :  { %v1974_v49 = vpop.eup %1973 }
 0x301   :  { %v443_v50 = vadd.f32 1.0, %v1974_v49 }
 0x303   :  { %1981 = vrcp.f32 %v443_v50 }
 0x304   :  { %v1976_v51 = vpop.eup %1975 }
 0x305   :  { %v444_v52 = vadd.f32 1.0, %v1976_v51  ;;  %v1978_v53 = vpop.eup %1977 }
 0x306   :  { %v459_v54 = vmul.f32 %v1978_v53, %v452_v37  ;;  %v1980_v55 = vpop.eup %1979 }
 0x307   :  { %1983 = vrcp.f32 %v444_v52  ;;  %v461_v57 = vmul.f32 %v1980_v55, %v453_v43 }
 0x308   :  { %v462_v56 = vsub.f32 %v459_v54, %v2565_v60 }
 0x309   :  { %v463_v62 = vsub.f32 %v461_v57, %v2571_v33 }
 0x310   :  { %v1982_v58 = vpop.eup %1981 }
 0x311   :  { %v464_v59 = vmul.f32 %v1982_v58, %v462_v56 }
 0x313   :  { %v2609_v63 = vadd.f32 %v464_v59, %v2565_v60 }
 0x314   :  { %v1984_v34 = vpop.eup %1983 }
 0x315   :  { %540 = vmatmul.mubr.f32.vlgmr.msra.gmra.mxu1 %v2609_v63  ;;  %v465_v36 = vmul.f32 %v1984_v34, %v463_v62 }
 0x316   :  { %545 = vmatprep.mubr.f32.mxu1 %v3069_v0  ;;  %706 = vmatpush1.msra.mxu1 %v2350_v2 }
 0x317   :  { %v2615_v37 = vadd.f32 %v465_v36, %v2571_v33  ;;  %707 = vmatprep.subr.mxu1 %v2352_v3 }
 0x318   :  { %708 = vmatpush1.msra.mxu1 %v2355_v4 }
 0x319   :  { %546 = vmatmul.mubr.f32.gmra.mxu1 %v2615_v37  ;;  %709 = vmatprep.subr.mxu1 %v2359_v5 }
 0x31a   :  { %710 = vmatpush1.msra.mxu1 %v2363_v6  ;;  %769 = vmatprep.mubr.f32.mxu1 %v3069_v0 }
 0x31b   :  { %711 = vmatprep.subr.mxu1 %v2367_v7 }
 0x31c   :  { %712 = vmatpush1.msra.mxu1 %v2371_v8 }
 0x31d   :  { %713 = vmatprep.subr.mxu1 %v2375_v9 }
 0x31e   :  { %714 = vmatpush1.msra.mxu1 %v2379_v10 }
 0x31f   :  { %715 = vmatprep.subr.mxu1 %v2383_v11 }
 0x320   :  { %716 = vmatpush1.msra.mxu1 %v2387_v12 }
 0x321   :  { %717 = vmatprep.subr.mxu1 %v2391_v13 }
 0x322   :  { %718 = vmatpush1.msra.mxu1 %v2395_v14 }
 0x323   :  { %719 = vmatprep.subr.mxu1 %v2399_v15 }
 0x324   :  { %720 = vmatpush1.msra.mxu1 %v2403_v16 }
 0x325   :  { %721 = vmatprep.subr.mxu1 %v2407_v17 }
 0x326   :  { %722 = vmatpush1.msra.mxu1 %v2411_v18 }
 0x327   :  { %723 = vmatprep.subr.mxu1 %v2415_v19 }
 0x328   :  { %724 = vmatpush1.msra.mxu1 %v2419_v20 }
 0x329   :  { %725 = vmatprep.subr.mxu1 %v2423_v21 }
 0x32a   :  { %726 = vmatpush1.msra.mxu1 %v2427_v22 }
 0x32b   :  { %727 = vmatprep.subr.mxu1 %v2431_v23 }
 0x32c   :  { %728 = vmatpush1.msra.mxu1 %v2435_v24 }
 0x32d   :  { %729 = vmatprep.subr.mxu1 %v2439_v25 }
 0x32e   :  { %730 = vmatpush1.msra.mxu1 %v2443_v26 }
 0x32f   :  { %731 = vmatprep.subr.mxu1 %v2447_v27 }
 0x330   :  { %732 = vmatpush1.msra.mxu1 %v2451_v28 }
 0x331   :  { %733 = vmatprep.subr.mxu1 %v2455_v29 }
 0x332   :  { %734 = vmatpush1.msra.mxu1 %v2459_v30 }
 0x333   :  { %735 = vmatprep.subr.mxu1 %v2463_v31 }
 0x334   :  { %736 = vmatpush1.msra.mxu1 %v2467_v32 }
 0x335   :  { %935 = vmatprep.subr.mxu1 %v2348_v1 }
 0x3d5   :  { %v541_v39 = vpop.f32.mrf.mxu1 }
 0x3d6   :  { %v567_v40 = vadd.f32 %v565_v38, %v541_v39 }
 0x3d7   :  { %v543_v41 = vpop.f32.mrf.mxu1 }
 0x3d8   :  { %v1810_v43 = vmul.f32 -1.442695, %v543_v41  ;;  %v569_v45 = vand.u32 2147483647, %v567_v40 }
 0x3d9   :  { %v547_v44 = vpop.f32.mrf.mxu1 }
 0x3da   :  { %1985 = vpow2.f32 %v1810_v43  ;;  %v568_v46 = vadd.f32 %v566_v42, %v547_v44  ;;  %v571_v49 = vadd.f32 1.0, %v569_v45  ;;  %v680_v43 = vld [vmem:[#allocation4 + $0x40] sm:$0xff] }
 0x3db   :  { %v549_v47 = vpop.f32.mrf.mxu1 }
 0x3dc   :  { %v1811_v48 = vmul.f32 -1.442695, %v549_v47  ;;  %v570_v50 = vand.u32 2147483647, %v568_v46  ;;  %v681_v47 = vld [vmem:[#allocation4 + $0x48] sm:$0xff] }
 0x3de   :  { %1987 = vpow2.f32 %v1811_v48  ;;  %v572_v51 = vadd.f32 1.0, %v570_v50 }
 0x3df   :  { %1989 = vrcp.f32 %v571_v49 }
 0x3e0   :  { %1991 = vrcp.f32 %v572_v51 }
 0x3e7   :  { %v1986_v52 = vpop.eup %1985 }
 0x3e8   :  { %v558_v53 = vadd.f32 1.0, %v1986_v52 }
 0x3ea   :  { %1993 = vrcp.f32 %v558_v53 }
 0x3eb   :  { %v1988_v54 = vpop.eup %1987 }
 0x3ec   :  { %v559_v55 = vadd.f32 1.0, %v1988_v54  ;;  %v1990_v56 = vpop.eup %1989 }
 0x3ed   :  { %v574_v57 = vmul.f32 %v1990_v56, %v567_v40  ;;  %v1992_v58 = vpop.eup %1991 }
 0x3ee   :  { %1995 = vrcp.f32 %v559_v55  ;;  %v576_v62 = vmul.f32 %v1992_v58, %v568_v46 }
 0x3ef   :  { %v577_v59 = vsub.f32 %v574_v57, %v2609_v63 }
 0x3f0   :  { %v578_v38 = vsub.f32 %v576_v62, %v2615_v37 }
 0x3f7   :  { %v1994_v34 = vpop.eup %1993 }
 0x3f8   :  { %v579_v36 = vmul.f32 %v1994_v34, %v577_v59 }
 0x3fa   :  { %v2653_v39 = vadd.f32 %v579_v36, %v2609_v63 }
 0x3fb   :  { %v1996_v41 = vpop.eup %1995 }
 0x3fc   :  { %655 = vmatmul.mubr.f32.vlgmr.msra.gmra.mxu0 %v2653_v39  ;;  %v580_v42 = vmul.f32 %v1996_v41, %v578_v38 }
 0x3fd   :  { %660 = vmatprep.mubr.f32.mxu0 %v3069_v0  ;;  %821 = vmatpush1.msra.mxu0 %v2350_v2 }
 0x3fe   :  { %v2659_v40 = vadd.f32 %v580_v42, %v2615_v37  ;;  %822 = vmatprep.subr.mxu0 %v2352_v3 }
 0x3ff   :  { %823 = vmatpush1.msra.mxu0 %v2355_v4 }
 0x400   :  { %661 = vmatmul.mubr.f32.gmra.mxu0 %v2659_v40  ;;  %824 = vmatprep.subr.mxu0 %v2359_v5 }
 0x401   :  { %825 = vmatpush1.msra.mxu0 %v2363_v6  ;;  %884 = vmatprep.mubr.f32.mxu0 %v3069_v0 }
 0x402   :  { %826 = vmatprep.subr.mxu0 %v2367_v7 }
 0x403   :  { %827 = vmatpush1.msra.mxu0 %v2371_v8 }
 0x404   :  { %828 = vmatprep.subr.mxu0 %v2375_v9 }
 0x405   :  { %829 = vmatpush1.msra.mxu0 %v2379_v10 }
 0x406   :  { %830 = vmatprep.subr.mxu0 %v2383_v11 }
 0x407   :  { %831 = vmatpush1.msra.mxu0 %v2387_v12 }
 0x408   :  { %832 = vmatprep.subr.mxu0 %v2391_v13 }
 0x409   :  { %833 = vmatpush1.msra.mxu0 %v2395_v14 }
 0x40a   :  { %834 = vmatprep.subr.mxu0 %v2399_v15 }
 0x40b   :  { %835 = vmatpush1.msra.mxu0 %v2403_v16 }
 0x40c   :  { %836 = vmatprep.subr.mxu0 %v2407_v17 }
 0x40d   :  { %837 = vmatpush1.msra.mxu0 %v2411_v18 }
 0x40e   :  { %838 = vmatprep.subr.mxu0 %v2415_v19 }
 0x40f   :  { %839 = vmatpush1.msra.mxu0 %v2419_v20 }
 0x410   :  { %840 = vmatprep.subr.mxu0 %v2423_v21 }
 0x411   :  { %841 = vmatpush1.msra.mxu0 %v2427_v22 }
 0x412   :  { %842 = vmatprep.subr.mxu0 %v2431_v23 }
 0x413   :  { %843 = vmatpush1.msra.mxu0 %v2435_v24 }
 0x414   :  { %844 = vmatprep.subr.mxu0 %v2439_v25 }
 0x415   :  { %845 = vmatpush1.msra.mxu0 %v2443_v26 }
 0x416   :  { %846 = vmatprep.subr.mxu0 %v2447_v27 }
 0x417   :  { %847 = vmatpush1.msra.mxu0 %v2451_v28 }
 0x418   :  { %848 = vmatprep.subr.mxu0 %v2455_v29 }
 0x419   :  { %849 = vmatpush1.msra.mxu0 %v2459_v30 }
 0x41a   :  { %850 = vmatprep.subr.mxu0 %v2463_v31 }
 0x41b   :  { %851 = vmatpush1.msra.mxu0 %v2467_v32 }
 0x41c   :  { %1050 = vmatprep.subr.mxu0 %v2348_v1 }
 0x4bc   :  { %v656_v44 = vpop.f32.mrf.mxu0 }
 0x4bd   :  { %v682_v45 = vadd.f32 %v680_v43, %v656_v44 }
 0x4be   :  { %v658_v46 = vpop.f32.mrf.mxu0 }
 0x4bf   :  { %v1812_v48 = vmul.f32 -1.442695, %v658_v46  ;;  %v684_v50 = vand.u32 2147483647, %v682_v45 }
 0x4c0   :  { %v662_v49 = vpop.f32.mrf.mxu0 }
 0x4c1   :  { %1997 = vpow2.f32 %v1812_v48  ;;  %v683_v51 = vadd.f32 %v681_v47, %v662_v49  ;;  %v686_v54 = vadd.f32 1.0, %v684_v50 }
 0x4c2   :  { %v664_v52 = vpop.f32.mrf.mxu0 }
 0x4c3   :  { %v1813_v53 = vmul.f32 -1.442695, %v664_v52  ;;  %v685_v55 = vand.u32 2147483647, %v683_v51 }
 0x4c5   :  { %1999 = vpow2.f32 %v1813_v53  ;;  %v687_v56 = vadd.f32 1.0, %v685_v55 }
 0x4c6   :  { %2001 = vrcp.f32 %v686_v54 }
 0x4c7   :  { %2003 = vrcp.f32 %v687_v56 }
 0x4ce   :  { %v1998_v57 = vpop.eup %1997 }
 0x4cf   :  { %v673_v58 = vadd.f32 1.0, %v1998_v57 }
 0x4d1   :  { %2005 = vrcp.f32 %v673_v58 }
 0x4d2   :  { %v2000_v59 = vpop.eup %1999 }
 0x4d3   :  { %v674_v62 = vadd.f32 1.0, %v2000_v59  ;;  %v2002_v34 = vpop.eup %2001 }
 0x4d4   :  { %v689_v36 = vmul.f32 %v2002_v34, %v682_v45  ;;  %v2004_v38 = vpop.eup %2003 }
 0x4d5   :  { %2007 = vrcp.f32 %v674_v62  ;;  %v691_v42 = vmul.f32 %v2004_v38, %v683_v51 }
 0x4d6   :  { %v692_v41 = vsub.f32 %v689_v36, %v2653_v39 }
 0x4d7   :  { %v693_v46 = vsub.f32 %v691_v42, %v2659_v40 }
 0x4de   :  { %v2006_v43 = vpop.eup %2005 }
 0x4df   :  { %v694_v44 = vmul.f32 %v2006_v43, %v692_v41  ;;  %v2745_v41 = vld [vmem:[#allocation7 + $0xf0] sm:$0xff]  ;;  %v2751_v43 = vld [vmem:[#allocation7 + $0xe8] sm:$0xff] }
 0x4e1   :  { %v2697_v47 = vadd.f32 %v694_v44, %v2653_v39  ;;  %v2754_v44 = vld [vmem:[#allocation7 + $0xe0] sm:$0xff] }
 0x4e2   :  { %v2008_v48 = vpop.eup %2007 }
 0x4e3   :  { %770 = vmatmul.mubr.f32.vlgmr.msra.gmra.mxu1 %v2697_v47  ;;  %v695_v49 = vmul.f32 %v2008_v48, %v693_v46  ;;  %v2758_v46 = vld [vmem:[#allocation7 + $0xd8] sm:$0xff]  ;;  %v2761_v48 = vld [vmem:[#allocation7 + $0xd0] sm:$0xff] }
 0x4e4   :  { %775 = vmatprep.mubr.f32.mxu1 %v3069_v0  ;;  %936 = vmatpush1.msra.mxu1 %v2350_v2  ;;  %v795_v2 = vld [vmem:[#allocation4 + $0x50] sm:$0xff] }
 0x4e5   :  { %v2703_v45 = vadd.f32 %v695_v49, %v2659_v40  ;;  %937 = vmatprep.subr.mxu1 %v2352_v3  ;;  %v2765_v49 = vld [vmem:[#allocation7 + $0xc8] sm:$0xff] }
 0x4e6   :  { %938 = vmatpush1.msra.mxu1 %v2355_v4 }
 0x4e7   :  { %776 = vmatmul.mubr.f32.gmra.mxu1 %v2703_v45  ;;  %939 = vmatprep.subr.mxu1 %v2359_v5 }
 0x4e8   :  { %940 = vmatpush1.msra.mxu1 %v2363_v6  ;;  %999 = vmatprep.mubr.f32.mxu1 %v3069_v0  ;;  %v796_v6 = vld [vmem:[#allocation4 + $0x58] sm:$0xff] }
 0x4e9   :  { %941 = vmatprep.subr.mxu1 %v2367_v7 }
 0x4ea   :  { %942 = vmatpush1.msra.mxu1 %v2371_v8 }
 0x4eb   :  { %943 = vmatprep.subr.mxu1 %v2375_v9 }
 0x4ec   :  { %944 = vmatpush1.msra.mxu1 %v2379_v10 }
 0x4ed   :  { %945 = vmatprep.subr.mxu1 %v2383_v11 }
 0x4ee   :  { %946 = vmatpush1.msra.mxu1 %v2387_v12 }
 0x4ef   :  { %947 = vmatprep.subr.mxu1 %v2391_v13 }
 0x4f0   :  { %948 = vmatpush1.msra.mxu1 %v2395_v14 }
 0x4f1   :  { %949 = vmatprep.subr.mxu1 %v2399_v15 }
 0x4f2   :  { %950 = vmatpush1.msra.mxu1 %v2403_v16 }
 0x4f3   :  { %951 = vmatprep.subr.mxu1 %v2407_v17 }
 0x4f4   :  { %952 = vmatpush1.msra.mxu1 %v2411_v18 }
 0x4f5   :  { %953 = vmatprep.subr.mxu1 %v2415_v19 }
 0x4f6   :  { %954 = vmatpush1.msra.mxu1 %v2419_v20 }
 0x4f7   :  { %955 = vmatprep.subr.mxu1 %v2423_v21 }
 0x4f8   :  { %956 = vmatpush1.msra.mxu1 %v2427_v22 }
 0x4f9   :  { %957 = vmatprep.subr.mxu1 %v2431_v23 }
 0x4fa   :  { %958 = vmatpush1.msra.mxu1 %v2435_v24 }
 0x4fb   :  { %959 = vmatprep.subr.mxu1 %v2439_v25 }
 0x4fc   :  { %960 = vmatpush1.msra.mxu1 %v2443_v26 }
 0x4fd   :  { %961 = vmatprep.subr.mxu1 %v2447_v27 }
 0x4fe   :  { %962 = vmatpush1.msra.mxu1 %v2451_v28 }
 0x4ff   :  { %963 = vmatprep.subr.mxu1 %v2455_v29 }
 0x500   :  { %964 = vmatpush1.msra.mxu1 %v2459_v30 }
 0x501   :  { %965 = vmatprep.subr.mxu1 %v2463_v31 }
 0x502   :  { %966 = vmatpush1.msra.mxu1 %v2467_v32 }
 0x503   :  { %1165 = vmatprep.subr.mxu1 %v2348_v1 }
 0x5a3   :  { %v771_v3 = vpop.f32.mrf.mxu1 }
 0x5a4   :  { %v797_v4 = vadd.f32 %v795_v2, %v771_v3  ;;  %v2768_v2 = vld [vmem:[#allocation7 + $0xc0] sm:$0xff]  ;;  %v2771_v3 = vld [vmem:[#allocation7 + $0xb8] sm:$0xff] }
 0x5a5   :  { %v773_v5 = vpop.f32.mrf.mxu1 }
 0x5a6   :  { %v1814_v7 = vmul.f32 -1.442695, %v773_v5  ;;  %v799_v9 = vand.u32 2147483647, %v797_v4  ;;  %v2777_v5 = vld [vmem:[#allocation7 + $0xa8] sm:$0xff] }
 0x5a7   :  { %v777_v8 = vpop.f32.mrf.mxu1 }
 0x5a8   :  { %2009 = vpow2.f32 %v1814_v7  ;;  %v798_v10 = vadd.f32 %v796_v6, %v777_v8  ;;  %v801_v13 = vadd.f32 1.0, %v799_v9  ;;  %v2780_v6 = vld [vmem:[#allocation7 + $0xa0] sm:$0xff]  ;;  %v2783_v7 = vld [vmem:[#allocation7 + $0x98] sm:$0xff]  ;;  %v2786_v8 = vld [vmem:[#allocation7 + $0x90] sm:$0xff] }
 0x5a9   :  { %v779_v11 = vpop.f32.mrf.mxu1  ;;  %v2789_v9 = vld [vmem:[#allocation7 + $0x88] sm:$0xff] }
 0x5aa   :  { %v1815_v12 = vmul.f32 -1.442695, %v779_v11  ;;  %v800_v14 = vand.u32 2147483647, %v798_v10 }
 0x5ac   :  { %2011 = vpow2.f32 %v1815_v12  ;;  %v802_v15 = vadd.f32 1.0, %v800_v14 }
 0x5ad   :  { %2013 = vrcp.f32 %v801_v13 }
 0x5ae   :  { %2015 = vrcp.f32 %v802_v15 }
 0x5b5   :  { %v2010_v50 = vpop.eup %2009 }
 0x5b6   :  { %v788_v1 = vadd.f32 1.0, %v2010_v50 }
 0x5b8   :  { %2017 = vrcp.f32 %v788_v1 }
 0x5b9   :  { %v2012_v51 = vpop.eup %2011 }
 0x5ba   :  { %v789_v52 = vadd.f32 1.0, %v2012_v51  ;;  %v2014_v53 = vpop.eup %2013 }
 0x5bb   :  { %v804_v54 = vmul.f32 %v2014_v53, %v797_v4  ;;  %v2016_v55 = vpop.eup %2015  ;;  %v2774_v4 = vld [vmem:[#allocation7 + $0xb0] sm:$0xff] }
 0x5bc   :  { %2019 = vrcp.f32 %v789_v52  ;;  %v806_v57 = vmul.f32 %v2016_v55, %v798_v10 }
 0x5bd   :  { %v807_v56 = vsub.f32 %v804_v54, %v2697_v47 }
 0x5be   :  { %v808_v62 = vsub.f32 %v806_v57, %v2703_v45  ;;  %v2838_v57 = vld [vmem:[#allocation7 + $0x80] sm:$0xff] }
 0x5c5   :  { %v2018_v58 = vpop.eup %2017 }
 0x5c6   :  { %v809_v59 = vmul.f32 %v2018_v58, %v807_v56  ;;  %v2841_v58 = vld [vmem:[#allocation7 + $0x78] sm:$0xff] }
 0x5c8   :  { %v2741_v34 = vadd.f32 %v809_v59, %v2697_v47  ;;  %v2844_v59 = vld [vmem:[#allocation7 + $0x70] sm:$0xff] }
 0x5c9   :  { %v2020_v36 = vpop.eup %2019 }
 0x5ca   :  { %885 = vmatmul.mubr.f32.vlgmr.msra.gmra.mxu0 %v2741_v34  ;;  %v810_v38 = vmul.f32 %v2020_v36, %v808_v62  ;;  %v2847_v62 = vld [vmem:[#allocation7 + $0x68] sm:$0xff]  ;;  %v2850_v36 = vld [vmem:[#allocation7 + $0x60] sm:$0xff] }
 0x5cb   :  { %890 = vmatprep.mubr.f32.mxu0 %v3069_v0  ;;  %1051 = vmatpush1.msra.mxu0 %v2745_v41 }
 0x5cc   :  { %v2749_v42 = vadd.f32 %v810_v38, %v2703_v45  ;;  %1052 = vmatprep.subr.mxu0 %v2751_v43  ;;  %v2853_v38 = vld [vmem:[#allocation7 + $0x58] sm:$0xff] }
 0x5cd   :  { %1053 = vmatpush1.msra.mxu0 %v2754_v44 }
 0x5ce   :  { %891 = vmatmul.mubr.f32.gmra.mxu0 %v2749_v42  ;;  %1054 = vmatprep.subr.mxu0 %v2758_v46 }
 0x5cf   :  { %1055 = vmatpush1.msra.mxu0 %v2761_v48  ;;  %1114 = vmatprep.mubr.f32.mxu0 %v3069_v0 }
 0x5d0   :  { %1056 = vmatprep.subr.mxu0 %v2765_v49 }
 0x5d1   :  { %1057 = vmatpush1.msra.mxu0 %v2768_v2 }
 0x5d2   :  { %1058 = vmatprep.subr.mxu0 %v2771_v3 }
 0x5d3   :  { %1059 = vmatpush1.msra.mxu0 %v2774_v4 }
 0x5d4   :  { %1060 = vmatprep.subr.mxu0 %v2777_v5 }
 0x5d5   :  { %1061 = vmatpush1.msra.mxu0 %v2780_v6 }
 0x5d6   :  { %1062 = vmatprep.subr.mxu0 %v2783_v7 }
 0x5d7   :  { %1063 = vmatpush1.msra.mxu0 %v2786_v8 }
 0x5d8   :  { %1064 = vmatprep.subr.mxu0 %v2789_v9 }
 0x5d9   :  { %1065 = vmatpush1.msra.mxu0 %v2403_v16  ;;  %v2809_v16 = vld [vmem:[#allocation7 + $0xf8] sm:$0xff] }
 0x5da   :  { %1066 = vmatprep.subr.mxu0 %v2407_v17  ;;  %v910_v17 = vld [vmem:[#allocation4 + $0x60] sm:$0xff] }
 0x5db   :  { %1067 = vmatpush1.msra.mxu0 %v2411_v18 }
 0x5dc   :  { %1068 = vmatprep.subr.mxu0 %v2415_v19 }
 0x5dd   :  { %1069 = vmatpush1.msra.mxu0 %v2419_v20 }
 0x5de   :  { %1070 = vmatprep.subr.mxu0 %v2423_v21  ;;  %v911_v21 = vld [vmem:[#allocation4 + $0x68] sm:$0xff] }
 0x5df   :  { %1071 = vmatpush1.msra.mxu0 %v2427_v22 }
 0x5e0   :  { %1072 = vmatprep.subr.mxu0 %v2431_v23 }
 0x5e1   :  { %1073 = vmatpush1.msra.mxu0 %v2435_v24 }
 0x5e2   :  { %1074 = vmatprep.subr.mxu0 %v2439_v25 }
 0x5e3   :  { %1075 = vmatpush1.msra.mxu0 %v2443_v26 }
 0x5e4   :  { %1076 = vmatprep.subr.mxu0 %v2447_v27 }
 0x5e5   :  { %1077 = vmatpush1.msra.mxu0 %v2451_v28 }
 0x5e6   :  { %1078 = vmatprep.subr.mxu0 %v2455_v29 }
 0x5e7   :  { %1079 = vmatpush1.msra.mxu0 %v2459_v30 }
 0x5e8   :  { %1080 = vmatprep.subr.mxu0 %v2463_v31 }
 0x5e9   :  { %1081 = vmatpush1.msra.mxu0 %v2467_v32 }
 0x5ea   :  { %1280 = vmatprep.subr.mxu0 %v2809_v16 }
 0x68a   :  { %v886_v18 = vpop.f32.mrf.mxu0 }
 0x68b   :  { %v912_v19 = vadd.f32 %v910_v17, %v886_v18  ;;  %v2856_v17 = vld [vmem:[#allocation7 + $0x50] sm:$0xff]  ;;  %v2859_v18 = vld [vmem:[#allocation7 + $0x48] sm:$0xff] }
 0x68c   :  { %v888_v20 = vpop.f32.mrf.mxu0 }
 0x68d   :  { %v1816_v22 = vmul.f32 -1.442695, %v888_v20  ;;  %v914_v24 = vand.u32 2147483647, %v912_v19  ;;  %v2865_v20 = vld [vmem:[#allocation7 + $0x38] sm:$0xff] }
 0x68e   :  { %v892_v23 = vpop.f32.mrf.mxu0 }
 0x68f   :  { %2021 = vpow2.f32 %v1816_v22  ;;  %v913_v25 = vadd.f32 %v911_v21, %v892_v23  ;;  %v916_v28 = vadd.f32 1.0, %v914_v24  ;;  %v2868_v21 = vld [vmem:[#allocation7 + $0x30] sm:$0xff]  ;;  %v2871_v22 = vld [vmem:[#allocation7 + $0x28] sm:$0xff]  ;;  %v2874_v23 = vld [vmem:[#allocation7 + $0x20] sm:$0xff] }
 0x690   :  { %v894_v26 = vpop.f32.mrf.mxu0  ;;  %v2877_v24 = vld [vmem:[#allocation7 + $0x18] sm:$0xff] }
 0x691   :  { %v1817_v27 = vmul.f32 -1.442695, %v894_v26  ;;  %v915_v29 = vand.u32 2147483647, %v913_v25  ;;  %v2883_v26 = vld [vmem:[#allocation7 + $0x8] sm:$0xff] }
 0x693   :  { %2023 = vpow2.f32 %v1817_v27  ;;  %v917_v30 = vadd.f32 1.0, %v915_v29  ;;  %v2886_v27 = vld [vmem:[#allocation7] sm:$0xff] }
 0x694   :  { %2025 = vrcp.f32 %v916_v28  ;;  %v1025_v28 = vld [vmem:[#allocation4 + $0x70] sm:$0xff] }
 0x695   :  { %2027 = vrcp.f32 %v917_v30 }
 0x69c   :  { %v2022_v31 = vpop.eup %2021 }
 0x69d   :  { %v903_v32 = vadd.f32 1.0, %v2022_v31 }
 0x69f   :  { %2029 = vrcp.f32 %v903_v32  ;;  %v1026_v32 = vld [vmem:[#allocation4 + $0x78] sm:$0xff] }
 0x6a0   :  { %v2024_v10 = vpop.eup %2023 }
 0x6a1   :  { %v904_v11 = vadd.f32 1.0, %v2024_v10  ;;  %v2026_v12 = vpop.eup %2025 }
 0x6a2   :  { %v919_v13 = vmul.f32 %v2026_v12, %v912_v19  ;;  %v2028_v14 = vpop.eup %2027  ;;  %v2862_v19 = vld [vmem:[#allocation7 + $0x40] sm:$0xff] }
 0x6a3   :  { %2031 = vrcp.f32 %v904_v11  ;;  %v921_v50 = vmul.f32 %v2028_v14, %v913_v25  ;;  %v2880_v25 = vld [vmem:[#allocation7 + $0x10] sm:$0xff] }
 0x6a4   :  { %v922_v15 = vsub.f32 %v919_v13, %v2741_v34 }
 0x6a5   :  { %v923_v52 = vsub.f32 %v921_v50, %v2749_v42 }
 0x6ac   :  { %v2030_v1 = vpop.eup %2029 }
 0x6ad   :  { %v924_v51 = vmul.f32 %v2030_v1, %v922_v15 }
 0x6af   :  { %v2815_v53 = vadd.f32 %v924_v51, %v2741_v34 }
 0x6b0   :  { %v2032_v54 = vpop.eup %2031 }
 0x6b1   :  { %1000 = vmatmul.mubr.f32.vlgmr.msra.gmra.mxu1 %v2815_v53  ;;  %v925_v55 = vmul.f32 %v2032_v54, %v923_v52 }
 0x6b2   :  { %1005 = vmatprep.mubr.f32.mxu1 %v3069_v0  ;;  %1166 = vmatpush1.msra.mxu1 %v2745_v41 }
 0x6b3   :  { %v2821_v56 = vadd.f32 %v925_v55, %v2749_v42  ;;  %1167 = vmatprep.subr.mxu1 %v2751_v43 }
 0x6b4   :  { %1168 = vmatpush1.msra.mxu1 %v2754_v44 }
 0x6b5   :  { %3072 = vst [vmem:[#allocation21_spill] sm:$0xff] %v2821_v56  ;;  %1006 = vmatmul.mubr.f32.gmra.mxu1 %v2821_v56  ;;  %1169 = vmatprep.subr.mxu1 %v2758_v46 }
 0x6b6   :  { %1170 = vmatpush1.msra.mxu1 %v2761_v48  ;;  %1229 = vmatprep.mubr.f32.mxu1 %v3069_v0 }
 0x6b7   :  { %1171 = vmatprep.subr.mxu1 %v2765_v49 }
 0x6b8   :  { %1172 = vmatpush1.msra.mxu1 %v2768_v2 }
 0x6b9   :  { %1173 = vmatprep.subr.mxu1 %v2771_v3 }
 0x6ba   :  { %1174 = vmatpush1.msra.mxu1 %v2774_v4 }
 0x6bb   :  { %1175 = vmatprep.subr.mxu1 %v2777_v5 }
 0x6bc   :  { %1176 = vmatpush1.msra.mxu1 %v2780_v6 }
 0x6bd   :  { %1177 = vmatprep.subr.mxu1 %v2783_v7 }
 0x6be   :  { %1178 = vmatpush1.msra.mxu1 %v2786_v8 }
 0x6bf   :  { %1179 = vmatprep.subr.mxu1 %v2789_v9 }
 0x6c0   :  { %1180 = vmatpush1.msra.mxu1 %v2838_v57 }
 0x6c1   :  { %1181 = vmatprep.subr.mxu1 %v2841_v58 }
 0x6c2   :  { %1182 = vmatpush1.msra.mxu1 %v2844_v59 }
 0x6c3   :  { %1183 = vmatprep.subr.mxu1 %v2847_v62 }
 0x6c4   :  { %1184 = vmatpush1.msra.mxu1 %v2850_v36 }
 0x6c5   :  { %1185 = vmatprep.subr.mxu1 %v2853_v38 }
 0x6c6   :  { %1186 = vmatpush1.msra.mxu1 %v2856_v17 }
 0x6c7   :  { %1187 = vmatprep.subr.mxu1 %v2859_v18 }
 0x6c8   :  { %1188 = vmatpush1.msra.mxu1 %v2862_v19 }
 0x6c9   :  { %1189 = vmatprep.subr.mxu1 %v2865_v20 }
 0x6ca   :  { %1190 = vmatpush1.msra.mxu1 %v2868_v21 }
 0x6cb   :  { %1191 = vmatprep.subr.mxu1 %v2871_v22 }
 0x6cc   :  { %1192 = vmatpush1.msra.mxu1 %v2874_v23 }
 0x6cd   :  { %1193 = vmatprep.subr.mxu1 %v2877_v24 }
 0x6ce   :  { %1194 = vmatpush1.msra.mxu1 %v2880_v25 }
 0x6cf   :  { %1195 = vmatprep.subr.mxu1 %v2883_v26 }
 0x6d0   :  { %1196 = vmatpush1.msra.mxu1 %v2886_v27 }
 0x6d1   :  { %1395 = vmatprep.subr.mxu1 %v2809_v16 }
 0x771   :  { %v1001_v29 = vpop.f32.mrf.mxu1 }
 0x772   :  { %v1027_v30 = vadd.f32 %v1025_v28, %v1001_v29 }
 0x773   :  { %v1003_v31 = vpop.f32.mrf.mxu1 }
 0x774   :  { %v1818_v10 = vmul.f32 -1.442695, %v1003_v31  ;;  %v1029_v12 = vand.u32 2147483647, %v1027_v30 }
 0x775   :  { %v1007_v11 = vpop.f32.mrf.mxu1 }
 0x776   :  { %2033 = vpow2.f32 %v1818_v10  ;;  %v1028_v13 = vadd.f32 %v1026_v32, %v1007_v11  ;;  %v1031_v50 = vadd.f32 1.0, %v1029_v12 }
 0x777   :  { %v1009_v14 = vpop.f32.mrf.mxu1 }
 0x778   :  { %v1819_v15 = vmul.f32 -1.442695, %v1009_v14  ;;  %v1030_v1 = vand.u32 2147483647, %v1028_v13 }
 0x77a   :  { %2035 = vpow2.f32 %v1819_v15  ;;  %v1032_v51 = vadd.f32 1.0, %v1030_v1 }
 0x77b   :  { %2037 = vrcp.f32 %v1031_v50 }
 0x77c   :  { %2039 = vrcp.f32 %v1032_v51 }
 0x783   :  { %v2034_v52 = vpop.eup %2033 }
 0x784   :  { %v1018_v16 = vadd.f32 1.0, %v2034_v52 }
 0x786   :  { %2041 = vrcp.f32 %v1018_v16 }
 0x787   :  { %v2036_v54 = vpop.eup %2035 }
 0x788   :  { %v1019_v55 = vadd.f32 1.0, %v2036_v54  ;;  %v2038_v28 = vpop.eup %2037  ;;  %v1141_v54 = vld [vmem:[#allocation4 + $0x88] sm:$0xff] }
 0x789   :  { %v1034_v29 = vmul.f32 %v2038_v28, %v1027_v30  ;;  %v2040_v31 = vpop.eup %2039 }
 0x78a   :  { %2043 = vrcp.f32 %v1019_v55  ;;  %v1036_v32 = vmul.f32 %v2040_v31, %v1028_v13  ;;  %v1140_v13 = vld [vmem:[#allocation4 + $0x80] sm:$0xff] }
 0x78b   :  { %v1037_v10 = vsub.f32 %v1034_v29, %v2815_v53 }
 0x78c   :  { %v1038_v12 = vsub.f32 %v1036_v32, %v2821_v56 }
 0x793   :  { %v2042_v11 = vpop.eup %2041 }
 0x794   :  { %v1039_v14 = vmul.f32 %v2042_v11, %v1037_v10 }
 0x796   :  { %v2893_v15 = vadd.f32 %v1039_v14, %v2815_v53 }
 0x797   :  { %v2044_v50 = vpop.eup %2043 }
 0x798   :  { %1115 = vmatmul.mubr.f32.vlgmr.msra.gmra.mxu0 %v2893_v15  ;;  %v1040_v1 = vmul.f32 %v2044_v50, %v1038_v12 }
 0x799   :  { %1120 = vmatprep.mubr.f32.mxu0 %v3069_v0  ;;  %1281 = vmatpush1.msra.mxu0 %v2745_v41 }
 0x79a   :  { %v2899_v30 = vadd.f32 %v1040_v1, %v2821_v56  ;;  %1282 = vmatprep.subr.mxu0 %v2751_v43 }
 0x79b   :  { %1283 = vmatpush1.msra.mxu0 %v2754_v44 }
 0x79c   :  { %1121 = vmatmul.mubr.f32.gmra.mxu0 %v2899_v30  ;;  %1284 = vmatprep.subr.mxu0 %v2758_v46 }
 0x79d   :  { %1285 = vmatpush1.msra.mxu0 %v2761_v48  ;;  %1344 = vmatprep.mubr.f32.mxu0 %v3069_v0 }
 0x79e   :  { %1286 = vmatprep.subr.mxu0 %v2765_v49 }
 0x79f   :  { %1287 = vmatpush1.msra.mxu0 %v2768_v2 }
 0x7a0   :  { %1288 = vmatprep.subr.mxu0 %v2771_v3 }
 0x7a1   :  { %1289 = vmatpush1.msra.mxu0 %v2774_v4 }
 0x7a2   :  { %1290 = vmatprep.subr.mxu0 %v2777_v5 }
 0x7a3   :  { %1291 = vmatpush1.msra.mxu0 %v2780_v6 }
 0x7a4   :  { %1292 = vmatprep.subr.mxu0 %v2783_v7 }
 0x7a5   :  { %1293 = vmatpush1.msra.mxu0 %v2786_v8 }
 0x7a6   :  { %1294 = vmatprep.subr.mxu0 %v2789_v9 }
 0x7a7   :  { %1295 = vmatpush1.msra.mxu0 %v2838_v57 }
 0x7a8   :  { %1296 = vmatprep.subr.mxu0 %v2841_v58 }
 0x7a9   :  { %1297 = vmatpush1.msra.mxu0 %v2844_v59 }
 0x7aa   :  { %1298 = vmatprep.subr.mxu0 %v2847_v62 }
 0x7ab   :  { %1299 = vmatpush1.msra.mxu0 %v2850_v36 }
 0x7ac   :  { %1300 = vmatprep.subr.mxu0 %v2853_v38 }
 0x7ad   :  { %1301 = vmatpush1.msra.mxu0 %v2856_v17 }
 0x7ae   :  { %1302 = vmatprep.subr.mxu0 %v2859_v18 }
 0x7af   :  { %1303 = vmatpush1.msra.mxu0 %v2862_v19 }
 0x7b0   :  { %1304 = vmatprep.subr.mxu0 %v2865_v20 }
 0x7b1   :  { %1305 = vmatpush1.msra.mxu0 %v2868_v21 }
 0x7b2   :  { %1306 = vmatprep.subr.mxu0 %v2871_v22 }
 0x7b3   :  { %1307 = vmatpush1.msra.mxu0 %v2874_v23 }
 0x7b4   :  { %1308 = vmatprep.subr.mxu0 %v2877_v24 }
 0x7b5   :  { %1309 = vmatpush1.msra.mxu0 %v2880_v25 }
 0x7b6   :  { %1310 = vmatprep.subr.mxu0 %v2883_v26 }
 0x7b7   :  { %1311 = vmatpush1.msra.mxu0 %v2886_v27 }
 0x858   :  { %v1116_v51 = vpop.f32.mrf.mxu0 }
 0x859   :  { %v1142_v52 = vadd.f32 %v1140_v13, %v1116_v51 }
 0x85a   :  { %v1118_v16 = vpop.f32.mrf.mxu0 }
 0x85b   :  { %v1820_v55 = vmul.f32 -1.442695, %v1118_v16  ;;  %v1144_v29 = vand.u32 2147483647, %v1142_v52 }
 0x85c   :  { %v1122_v28 = vpop.f32.mrf.mxu0 }
 0x85d   :  { %2045 = vpow2.f32 %v1820_v55  ;;  %v1143_v31 = vadd.f32 %v1141_v54, %v1122_v28  ;;  %v1146_v11 = vadd.f32 1.0, %v1144_v29 }
 0x85e   :  { %v1124_v10 = vpop.f32.mrf.mxu0 }
 0x85f   :  { %v1821_v32 = vmul.f32 -1.442695, %v1124_v10  ;;  %v1145_v14 = vand.u32 2147483647, %v1143_v31 }
 0x861   :  { %2047 = vpow2.f32 %v1821_v32  ;;  %v1147_v12 = vadd.f32 1.0, %v1145_v14 }
 0x862   :  { %2049 = vrcp.f32 %v1146_v11 }
 0x863   :  { %2051 = vrcp.f32 %v1147_v12  ;;  %v3073_v12 = vmov 0.0  }
 0x86a   :  { %v2046_v50 = vpop.eup %2045 }
 0x86b   :  { %v1133_v1 = vadd.f32 1.0, %v2046_v50  ;;  %v1543_v50 = vld [vmem:[#allocation10 + $0x58] sm:$0xff] }
 0x86d   :  { %2053 = vrcp.f32 %v1133_v1  ;;  %v1542_v1 = vld [vmem:[#allocation10 + $0x50] sm:$0xff] }
 0x86e   :  { %v2048_v0 = vpop.eup %2047 }
 0x86f   :  { %v1134_v13 = vadd.f32 1.0, %v2048_v0  ;;  %v2050_v51 = vpop.eup %2049 }
 0x870   :  { %v1149_v16 = vmul.f32 %v2050_v51, %v1142_v52  ;;  %v2052_v56 = vpop.eup %2051  ;;  %v1540_v51 = vld [vmem:[#allocation10 + $0x40] sm:$0xff] }
 0x871   :  { %2055 = vrcp.f32 %v1134_v13  ;;  %v1151_v54 = vmul.f32 %v2052_v56, %v1143_v31  ;;  %v1544_v31 = vld [vmem:[#allocation10 + $0x60] sm:$0xff]  ;;  %v1541_v13 = vld [vmem:[#allocation10 + $0x48] sm:$0xff] }
 0x872   :  { %v1152_v55 = vsub.f32 %v1149_v16, %v2893_v15  ;;  %v1539_v16 = vld [vmem:[#allocation10 + $0x38] sm:$0xff] }
 0x873   :  { %v1153_v29 = vsub.f32 %v1151_v54, %v2899_v30  ;;  %v1537_v54 = vld [vmem:[#allocation10 + $0x28] sm:$0xff] }
 0x87a   :  { %v2054_v28 = vpop.eup %2053 }
 0x87b   :  { %v1154_v10 = vmul.f32 %v2054_v28, %v1152_v55  ;;  %v1538_v55 = vld [vmem:[#allocation10 + $0x30] sm:$0xff]  ;;  %v1535_v28 = vld [vmem:[#allocation10 + $0x18] sm:$0xff] }
 0x87d   :  { %v2936_v32 = vadd.f32 %v1154_v10, %v2893_v15  ;;  %v1534_v10 = vld [vmem:[#allocation10 + $0x10] sm:$0xff] }
 0x87e   :  { %v2056_v11 = vpop.eup %2055 }
 0x87f   :  { %1230 = vmatmul.mubr.f32.vlgmr.msra.gmra.mxu1 %v2936_v32  ;;  %v1155_v14 = vmul.f32 %v2056_v11, %v1153_v29  ;;  %v1533_v29 = vld [vmem:[#allocation10 + $0x8] sm:$0xff]  ;;  %v1532_v11 = vld [vmem:[#allocation10] sm:$0xff] }
 0x880   :  { %1235 = vmatprep.mubr.f32.mxu1 %v3073_v12  ;;  %1396 = vmatpush1.msra.mxu1 %v2745_v41  ;;  %v1547_v41 = vld [vmem:[#allocation10 + $0x78] sm:$0xff] }
 0x881   :  { %v2942_v0 = vadd.f32 %v1155_v14, %v2899_v30  ;;  %1397 = vmatprep.subr.mxu1 %v2751_v43  ;;  %1869 = vmatprep.subr.mxu0 %v1547_v41  ;;  %v1255_v43 = vld [vmem:[#allocation4 + $0x90] sm:$0xff] }
 0x882   :  { %1398 = vmatpush1.msra.mxu1 %v2754_v44 }
 0x883   :  { %1236 = vmatmul.mubr.f32.gmra.mxu1 %v2942_v0  ;;  %1399 = vmatprep.subr.mxu1 %v2758_v46 }
 0x884   :  { %1400 = vmatpush1.msra.mxu1 %v2761_v48  ;;  %1459 = vmatprep.mubr.f32.mxu1 %v3073_v12 }
 0x885   :  { %1401 = vmatprep.subr.mxu1 %v2765_v49  ;;  %v1256_v49 = vld [vmem:[#allocation4 + $0x98] sm:$0xff] }
 0x886   :  { %1402 = vmatpush1.msra.mxu1 %v2768_v2 }
 0x887   :  { %1403 = vmatprep.subr.mxu1 %v2771_v3 }
 0x888   :  { %1404 = vmatpush1.msra.mxu1 %v2774_v4 }
 0x889   :  { %1405 = vmatprep.subr.mxu1 %v2777_v5 }
 0x88a   :  { %1406 = vmatpush1.msra.mxu1 %v2780_v6 }
 0x88b   :  { %1407 = vmatprep.subr.mxu1 %v2783_v7 }
 0x88c   :  { %1408 = vmatpush1.msra.mxu1 %v2786_v8 }
 0x88d   :  { %1409 = vmatprep.subr.mxu1 %v2789_v9 }
 0x88e   :  { %1410 = vmatpush1.msra.mxu1 %v2838_v57 }
 0x88f   :  { %1411 = vmatprep.subr.mxu1 %v2841_v58 }
 0x890   :  { %1412 = vmatpush1.msra.mxu1 %v2844_v59 }
 0x891   :  { %1413 = vmatprep.subr.mxu1 %v2847_v62 }
 0x892   :  { %1414 = vmatpush1.msra.mxu1 %v2850_v36 }
 0x893   :  { %1415 = vmatprep.subr.mxu1 %v2853_v38 }
 0x894   :  { %1416 = vmatpush1.msra.mxu1 %v2856_v17 }
 0x895   :  { %1417 = vmatprep.subr.mxu1 %v2859_v18 }
 0x896   :  { %1418 = vmatpush1.msra.mxu1 %v2862_v19 }
 0x897   :  { %1419 = vmatprep.subr.mxu1 %v2865_v20 }
 0x898   :  { %1420 = vmatpush1.msra.mxu1 %v2868_v21 }
 0x899   :  { %1421 = vmatprep.subr.mxu1 %v2871_v22 }
 0x89a   :  { %1422 = vmatpush1.msra.mxu1 %v2874_v23 }
 0x89b   :  { %1423 = vmatprep.subr.mxu1 %v2877_v24 }
 0x89c   :  { %1424 = vmatpush1.msra.mxu1 %v2880_v25  ;;  %v1546_v25 = vld [vmem:[#allocation10 + $0x70] sm:$0xff] }
 0x89d   :  { %1425 = vmatprep.subr.mxu1 %v2883_v26 }
 0x89e   :  { %1426 = vmatpush1.msra.mxu1 %v2886_v27  ;;  %v1545_v27 = vld [vmem:[#allocation10 + $0x68] sm:$0xff] }
 0x93f   :  { %v1231_v44 = vpop.f32.mrf.mxu1 }
 0x940   :  { %v1257_v46 = vadd.f32 %v1255_v43, %v1231_v44 }
 0x941   :  { %v1233_v48 = vpop.f32.mrf.mxu1 }
 0x942   :  { %v1822_v2 = vmul.f32 -1.442695, %v1233_v48  ;;  %v1259_v4 = vand.u32 2147483647, %v1257_v46 }
 0x943   :  { %v1237_v3 = vpop.f32.mrf.mxu1 }
 0x944   :  { %2057 = vpow2.f32 %v1822_v2  ;;  %v1258_v5 = vadd.f32 %v1256_v49, %v1237_v3  ;;  %v1261_v8 = vadd.f32 1.0, %v1259_v4  ;;  %v3007_v49 = vld [vmem:[#allocation12] ss:$0 sm:$0xff] }
 0x945   :  { %v1239_v6 = vpop.f32.mrf.mxu1 }
 0x946   :  { %v1823_v7 = vmul.f32 -1.442695, %v1239_v6  ;;  %v1260_v9 = vand.u32 2147483647, %v1258_v5 }
 0x948   :  { %2059 = vpow2.f32 %v1823_v7  ;;  %v1262_v56 = vadd.f32 1.0, %v1260_v9 }
 0x949   :  { %2061 = vrcp.f32 %v1261_v8 }
 0x94a   :  { %2063 = vrcp.f32 %v1262_v56 }
 0x951   :  { %v2058_v57 = vpop.eup %2057 }
 0x952   :  { %v1248_v58 = vadd.f32 1.0, %v2058_v57 }
 0x954   :  { %2065 = vrcp.f32 %v1248_v58 }
 0x955   :  { %v2060_v59 = vpop.eup %2059 }
 0x956   :  { %v1249_v62 = vadd.f32 1.0, %v2060_v59  ;;  %v2062_v36 = vpop.eup %2061 }
 0x957   :  { %v1264_v38 = vmul.f32 %v2062_v36, %v1257_v46  ;;  %v2064_v17 = vpop.eup %2063 }
 0x958   :  { %2067 = vrcp.f32 %v1249_v62  ;;  %v1266_v19 = vmul.f32 %v2064_v17, %v1258_v5 }
 0x959   :  { %v1267_v18 = vsub.f32 %v1264_v38, %v2936_v32 }
 0x95a   :  { %v1268_v22 = vsub.f32 %v1266_v19, %v2942_v0 }
 0x961   :  { %v2066_v20 = vpop.eup %2065 }
 0x962   :  { %v1269_v21 = vmul.f32 %v2066_v20, %v1267_v18 }
 0x964   :  { %v2979_v23 = vadd.f32 %v1269_v21, %v2936_v32 }
 0x965   :  { %v2068_v24 = vpop.eup %2067 }
 0x966   :  { %1345 = vmatmul.mubr.f32.vlgmr.msra.gmra.mxu0 %v2979_v23  ;;  %v1270_v26 = vmul.f32 %v2068_v24, %v1268_v22 }
 0x967   :  { %1870 = vmatpush3.msra.mxu0 %v1547_v41  ;;  %1350 = vmatprep.mubr.f32.mxu0 %v3073_v12 }
 0x968   :  { %1871 = vmatprep.subr.mxu0 %v1546_v25  ;;  %v2984_v52 = vadd.f32 %v1270_v26, %v2942_v0 }
 0x969   :  { %1872 = vmatpush3.msra.mxu0 %v1546_v25 }
 0x96a   :  { %1873 = vmatprep.subr.mxu0 %v1545_v27  ;;  %1351 = vmatmul.mubr.f32.gmra.mxu0 %v2984_v52 }
 0x96b   :  { %1874 = vmatpush3.msra.mxu0 %v1545_v27  ;;  %1901 = vmatprep.mubr.f32.mxu0 %v2521_v61  ;;  %v1536_v61 = vld [vmem:[#allocation10 + $0x20] sm:$0xff] }
 0x96c   :  { %1875 = vmatprep.subr.mxu0 %v1544_v31 }
 0x96d   :  { %1876 = vmatpush3.msra.mxu0 %v1544_v31 }
 0x96e   :  { %1877 = vmatprep.subr.mxu0 %v1543_v50 }
 0x96f   :  { %1878 = vmatpush3.msra.mxu0 %v1543_v50 }
 0x970   :  { %1879 = vmatprep.subr.mxu0 %v1542_v1 }
 0x971   :  { %1880 = vmatpush3.msra.mxu0 %v1542_v1 }
 0x972   :  { %1881 = vmatprep.subr.mxu0 %v1541_v13 }
 0x973   :  { %1882 = vmatpush3.msra.mxu0 %v1541_v13 }
 0x974   :  { %1883 = vmatprep.subr.mxu0 %v1540_v51 }
 0x975   :  { %1884 = vmatpush3.msra.mxu0 %v1540_v51 }
 0x976   :  { %1885 = vmatprep.subr.mxu0 %v1539_v16 }
 0x977   :  { %1886 = vmatpush3.msra.mxu0 %v1539_v16 }
 0x978   :  { %1887 = vmatprep.subr.mxu0 %v1538_v55 }
 0x979   :  { %1888 = vmatpush3.msra.mxu0 %v1538_v55 }
 0x97a   :  { %1889 = vmatprep.subr.mxu0 %v1537_v54 }
 0x97b   :  { %1890 = vmatpush3.msra.mxu0 %v1537_v54 }
 0x97c   :  { %1891 = vmatprep.subr.mxu0 %v1536_v61 }
 0x97d   :  { %1892 = vmatpush3.msra.mxu0 %v1536_v61 }
 0x97e   :  { %1893 = vmatprep.subr.mxu0 %v1535_v28 }
 0x97f   :  { %1894 = vmatpush3.msra.mxu0 %v1535_v28 }
 0x980   :  { %1895 = vmatprep.subr.mxu0 %v1534_v10 }
 0x981   :  { %1896 = vmatpush3.msra.mxu0 %v1534_v10 }
 0x982   :  { %1897 = vmatprep.subr.mxu0 %v1533_v29 }
 0x983   :  { %1898 = vmatpush3.msra.mxu0 %v1533_v29 }
 0x984   :  { %1899 = vmatprep.subr.mxu0 %v1532_v11 }
 0x985   :  { %1900 = vmatpush3.msra.mxu0 %v1532_v11 }
 0x986   :  { %1902 = vmatmul.mubr.f32.vlgmr.msra.gmra.mxu0 %v2527_v35  ;;  %v3074_v35 = vld [vmem:[#allocation21_spill] sm:$0xff] }
 0x987   :  { %1904 = vmatprep.mubr.f32.mxu0 %v2565_v60  ;;  %v1370_v60 = vld [vmem:[#allocation4 + $0xa0] sm:$0xff] }
 0x98a   :  { %1905 = vmatmul.mubr.f32.gmra.mxu0 %v2571_v33 }
 0x98b   :  { %1907 = vmatprep.mubr.f32.mxu0 %v2609_v63 }
 0x98e   :  { %1908 = vmatmul.mubr.f32.gmra.mxu0 %v2615_v37 }
 0x98f   :  { %1910 = vmatprep.mubr.f32.mxu0 %v2653_v39  ;;  %v1371_v39 = vld [vmem:[#allocation4 + $0xa8] sm:$0xff] }
 0x992   :  { %1911 = vmatmul.mubr.f32.gmra.mxu0 %v2659_v40 }
 0x993   :  { %1913 = vmatprep.mubr.f32.mxu0 %v2697_v47 }
 0x996   :  { %1914 = vmatmul.mubr.f32.gmra.mxu0 %v2703_v45 }
 0x997   :  { %1916 = vmatprep.mubr.f32.mxu0 %v2741_v34 }
 0x99a   :  { %1917 = vmatmul.mubr.f32.gmra.mxu0 %v2749_v42 }
 0x99b   :  { %1919 = vmatprep.mubr.f32.mxu0 %v2815_v53 }
 0x99e   :  { %1920 = vmatmul.mubr.f32.gmra.mxu0 %v3074_v35 }
 0x99f   :  { %1922 = vmatprep.mubr.f32.mxu0 %v2893_v15 }
 0x9a2   :  { %1923 = vmatmul.mubr.f32.gmra.mxu0 %v2899_v30 }
 0x9a3   :  { %1925 = vmatprep.mubr.f32.mxu0 %v2936_v32 }
 0x9a6   :  { %1926 = vmatmul.mubr.f32.gmra.mxu0 %v2942_v0 }
 0x9a7   :  { %1928 = vmatprep.mubr.f32.mxu0 %v2979_v23 }
 0x9aa   :  { %1929 = vmatmul.mubr.f32.gmra.mxu0 %v2984_v52 }
 0xa26   :  { %v1346_v33 = vpop.f32.mrf.mxu0 }
 0xa27   :  { %v1372_v63 = vadd.f32 %v1370_v60, %v1346_v33 }
 0xa28   :  { %v1348_v37 = vpop.f32.mrf.mxu0 }
 0xa29   :  { %v1824_v40 = vmul.f32 -1.442695, %v1348_v37  ;;  %v1374_v45 = vand.u32 2147483647, %v1372_v63 }
 0xa2a   :  { %v1352_v47 = vpop.f32.mrf.mxu0 }
 0xa2b   :  { %2069 = vpow2.f32 %v1824_v40  ;;  %v1373_v34 = vadd.f32 %v1371_v39, %v1352_v47  ;;  %v1376_v15 = vadd.f32 1.0, %v1374_v45  ;;  %v1485_v45 = vld [vmem:[#allocation4 + $0xb0] sm:$0xff] }
 0xa2c   :  { %v1354_v42 = vpop.f32.mrf.mxu0 }
 0xa2d   :  { %v1825_v53 = vmul.f32 -1.442695, %v1354_v42  ;;  %v1375_v30 = vand.u32 2147483647, %v1373_v34 }
 0xa2f   :  { %2071 = vpow2.f32 %v1825_v53  ;;  %v1377_v32 = vadd.f32 1.0, %v1375_v30 }
 0xa30   :  { %2073 = vrcp.f32 %v1376_v15  ;;  %v1486_v15 = vld [vmem:[#allocation4 + $0xb8] sm:$0xff] }
 0xa31   :  { %2075 = vrcp.f32 %v1377_v32 }
 0xa38   :  { %v2070_v14 = vpop.eup %2069 }
 0xa39   :  { %v1363_v0 = vadd.f32 1.0, %v2070_v14 }
 0xa3b   :  { %2077 = vrcp.f32 %v1363_v0 }
 0xa3c   :  { %v2072_v41 = vpop.eup %2071 }
 0xa3d   :  { %v1364_v43 = vadd.f32 1.0, %v2072_v41  ;;  %v2074_v44 = vpop.eup %2073 }
 0xa3e   :  { %v1379_v46 = vmul.f32 %v2074_v44, %v1372_v63  ;;  %v2076_v48 = vpop.eup %2075 }
 0xa3f   :  { %2079 = vrcp.f32 %v1364_v43  ;;  %v1381_v4 = vmul.f32 %v2076_v48, %v1373_v34 }
 0xa40   :  { %v1382_v3 = vsub.f32 %v1379_v46, %v2979_v23 }
 0xa41   :  { %v1383_v57 = vsub.f32 %v1381_v4, %v2984_v52 }
 0xa46   :  { %v1903_v2 = vpop.f32.mrf.mxu0 }
 0xa47   :  { %v1625_v5 = vadd.f32 %v1903_v2, %v3007_v49 }
 0xa48   :  { %v2078_v6 = vpop.eup %2077  ;;  %v1619_v7 = vpop.f32.mrf.mxu0 }
 0xa49   :  { %1739 = vst [vmem:[#allocation13 + $0x8] sm:$0xff] %v1625_v5  ;;  %v1620_v8 = vadd.f32 %v3007_v49, %v1619_v7  ;;  %v1384_v9 = vmul.f32 %v2078_v6, %v1382_v3 }
 0xa4a   :  { %v1906_v56 = vpop.f32.mrf.mxu0 }
 0xa4b   :  { %1738 = vst [vmem:[#allocation13] sm:$0xff] %v1620_v8  ;;  %v1635_v58 = vadd.f32 %v1906_v56, %v3007_v49  ;;  %v3015_v59 = vadd.f32 %v1384_v9, %v2979_v23 }
 0xa4c   :  { %v2080_v62 = vpop.eup %2079  ;;  %v1629_v36 = vpop.f32.mrf.mxu0 }
 0xa4d   :  { %1741 = vst [vmem:[#allocation13 + $0x18] sm:$0xff] %v1635_v58  ;;  %v1630_v38 = vadd.f32 %v3007_v49, %v1629_v36  ;;  %1460 = vmatmul.mubr.f32.vlgmr.msra.gmra.mxu1 %v3015_v59  ;;  %1931 = vmatprep.mubr.f32.mxu0 %v3015_v59  ;;  %v1385_v17 = vmul.f32 %v2080_v62, %v1383_v57 }
 0xa4e   :  { %v1909_v18 = vpop.f32.mrf.mxu0  ;;  %1465 = vmatprep.mubr.f32.mxu1 %v3073_v12 }
 0xa4f   :  { %1740 = vst [vmem:[#allocation13 + $0x10] sm:$0xff] %v1630_v38  ;;  %v1645_v19 = vadd.f32 %v1909_v18, %v3007_v49  ;;  %v3023_v20 = vadd.f32 %v1385_v17, %v2984_v52 }
 0xa50   :  { %v1639_v21 = vpop.f32.mrf.mxu0 }
 0xa51   :  { %1743 = vst [vmem:[#allocation13 + $0x28] sm:$0xff] %v1645_v19  ;;  %v1640_v22 = vadd.f32 %v3007_v49, %v1639_v21  ;;  %1466 = vmatmul.mubr.f32.gmra.mxu1 %v3023_v20  ;;  %1932 = vmatmul.mubr.f32.gmra.mxu0 %v3023_v20 }
 0xa52   :  { %v1912_v23 = vpop.f32.mrf.mxu0 }
 0xa53   :  { %1742 = vst [vmem:[#allocation13 + $0x20] sm:$0xff] %v1640_v22  ;;  %v1655_v24 = vadd.f32 %v1912_v23, %v3007_v49 }
 0xa54   :  { %v1649_v25 = vpop.f32.mrf.mxu0 }
 0xa55   :  { %1745 = vst [vmem:[#allocation13 + $0x38] sm:$0xff] %v1655_v24  ;;  %v1650_v12 = vadd.f32 %v3007_v49, %v1649_v25 }
 0xa56   :  { %v1915_v26 = vpop.f32.mrf.mxu0 }
 0xa57   :  { %1744 = vst [vmem:[#allocation13 + $0x30] sm:$0xff] %v1650_v12  ;;  %v1665_v27 = vadd.f32 %v1915_v26, %v3007_v49 }
 0xa58   :  { %v1659_v52 = vpop.f32.mrf.mxu0 }
 0xa59   :  { %1747 = vst [vmem:[#allocation13 + $0x48] sm:$0xff] %v1665_v27  ;;  %v1660_v31 = vadd.f32 %v3007_v49, %v1659_v52 }
 0xa5a   :  { %v1918_v50 = vpop.f32.mrf.mxu0 }
 0xa5b   :  { %1746 = vst [vmem:[#allocation13 + $0x40] sm:$0xff] %v1660_v31  ;;  %v1675_v1 = vadd.f32 %v1918_v50, %v3007_v49 }
 0xa5c   :  { %v1669_v13 = vpop.f32.mrf.mxu0 }
 0xa5d   :  { %1749 = vst [vmem:[#allocation13 + $0x58] sm:$0xff] %v1675_v1  ;;  %v1670_v51 = vadd.f32 %v3007_v49, %v1669_v13 }
 0xa5e   :  { %v1921_v16 = vpop.f32.mrf.mxu0 }
 0xa5f   :  { %1748 = vst [vmem:[#allocation13 + $0x50] sm:$0xff] %v1670_v51  ;;  %v1685_v55 = vadd.f32 %v1921_v16, %v3007_v49 }
 0xa60   :  { %v1679_v54 = vpop.f32.mrf.mxu0 }
 0xa61   :  { %1751 = vst [vmem:[#allocation13 + $0x68] sm:$0xff] %v1685_v55  ;;  %v1680_v61 = vadd.f32 %v3007_v49, %v1679_v54 }
 0xa62   :  { %v1924_v28 = vpop.f32.mrf.mxu0 }
 0xa63   :  { %1750 = vst [vmem:[#allocation13 + $0x60] sm:$0xff] %v1680_v61  ;;  %v1695_v10 = vadd.f32 %v1924_v28, %v3007_v49 }
 0xa64   :  { %v1689_v29 = vpop.f32.mrf.mxu0 }
 0xa65   :  { %1753 = vst [vmem:[#allocation13 + $0x78] sm:$0xff] %v1695_v10  ;;  %v1690_v11 = vadd.f32 %v3007_v49, %v1689_v29 }
 0xa66   :  { %v1927_v35 = vpop.f32.mrf.mxu0 }
 0xa67   :  { %1752 = vst [vmem:[#allocation13 + $0x70] sm:$0xff] %v1690_v11  ;;  %v1705_v60 = vadd.f32 %v1927_v35, %v3007_v49 }
 0xa68   :  { %v1699_v33 = vpop.f32.mrf.mxu0 }
 0xa69   :  { %1755 = vst [vmem:[#allocation13 + $0x88] sm:$0xff] %v1705_v60  ;;  %v1700_v63 = vadd.f32 %v3007_v49, %v1699_v33 }
 0xa6a   :  { %v1930_v37 = vpop.f32.mrf.mxu0 }
 0xa6b   :  { %1754 = vst [vmem:[#allocation13 + $0x80] sm:$0xff] %v1700_v63  ;;  %v1715_v39 = vadd.f32 %v1930_v37, %v3007_v49 }
 0xa6c   :  { %v1709_v40 = vpop.f32.mrf.mxu0 }
 0xa6d   :  { %1757 = vst [vmem:[#allocation13 + $0x98] sm:$0xff] %v1715_v39  ;;  %v1710_v47 = vadd.f32 %v3007_v49, %v1709_v40 }
 0xa6f   :  { %1756 = vst [vmem:[#allocation13 + $0x90] sm:$0xff] %v1710_v47 }
 0xb0d   :  { %v1461_v34 = vpop.f32.mrf.mxu1 }
 0xb0e   :  { %v1487_v42 = vadd.f32 %v1485_v45, %v1461_v34 }
 0xb0f   :  { %v1463_v53 = vpop.f32.mrf.mxu1 }
 0xb10   :  { %v1826_v30 = vmul.f32 -1.442695, %v1463_v53  ;;  %v1489_v0 = vand.u32 2147483647, %v1487_v42 }
 0xb11   :  { %v1467_v32 = vpop.f32.mrf.mxu1  ;;  %v1933_v14 = vpop.f32.mrf.mxu0 }
 0xb12   :  { %2081 = vpow2.f32 %v1826_v30  ;;  %v1488_v41 = vadd.f32 %v1486_v15, %v1467_v32  ;;  %v1725_v43 = vadd.f32 %v1933_v14, %v3007_v49  ;;  %v1491_v3 = vadd.f32 1.0, %v1489_v0 }
 0xb13   :  { %v1469_v44 = vpop.f32.mrf.mxu1  ;;  %v1719_v46 = vpop.f32.mrf.mxu0 }
 0xb14   :  { %1759 = vst [vmem:[#allocation13 + $0xa8] sm:$0xff] %v1725_v43  ;;  %v1827_v48 = vmul.f32 -1.442695, %v1469_v44  ;;  %v1720_v2 = vadd.f32 %v3007_v49, %v1719_v46  ;;  %v1490_v4 = vand.u32 2147483647, %v1488_v41 }
 0xb16   :  { %2083 = vpow2.f32 %v1827_v48  ;;  %1758 = vst [vmem:[#allocation13 + $0xa0] sm:$0xff] %v1720_v2  ;;  %v1492_v5 = vadd.f32 1.0, %v1490_v4 }
 0xb17   :  { %2085 = vrcp.f32 %v1491_v3 }
 0xb18   :  { %2087 = vrcp.f32 %v1492_v5 }
 0xb1f   :  { %v2082_v6 = vpop.eup %2081 }
 0xb20   :  { %v1478_v7 = vadd.f32 1.0, %v2082_v6 }
 0xb22   :  { %2089 = vrcp.f32 %v1478_v7 }
 0xb23   :  { %v2084_v8 = vpop.eup %2083 }
 0xb24   :  { %v1479_v9 = vadd.f32 1.0, %v2084_v8  ;;  %v2086_v56 = vpop.eup %2085 }
 0xb25   :  { %v1494_v57 = vmul.f32 %v2086_v56, %v1487_v42  ;;  %v2088_v58 = vpop.eup %2087 }
 0xb26   :  { %2091 = vrcp.f32 %v1479_v9  ;;  %v1496_v36 = vmul.f32 %v2088_v58, %v1488_v41 }
 0xb27   :  { %v1497_v62 = vsub.f32 %v1494_v57, %v3015_v59 }
 0xb28   :  { %v1498_v18 = vsub.f32 %v1496_v36, %v3023_v20 }
 0xb2f   :  { %v2090_v38 = vpop.eup %2089 }
 0xb30   :  { %v1499_v17 = vmul.f32 %v2090_v38, %v1497_v62 }
 0xb32   :  { %v1501_v19 = vadd.f32 %v1499_v17, %v3015_v59 }
 0xb33   :  { %v2092_v21 = vpop.eup %2091 }
 0xb34   :  { %1934 = vmatprep.mubr.f32.mxu0 %v1501_v19  ;;  %1767 = vst [vmem:[#allocation14] sm:$0xff] %v1501_v19  ;;  %v1500_v22 = vmul.f32 %v2092_v21, %v1498_v18 }
 0xb36   :  { %v1502_v23 = vadd.f32 %v1500_v22, %v3023_v20 }
 0xb38   :  { %1935 = vmatmul.mubr.f32.gmra.mxu0 %v1502_v23  ;;  %1768 = vst [vmem:[#allocation14 + $0x8] sm:$0xff] %v1502_v23 }
 0xb39   :  { %2236 = shalt.err (!%p2233_p1)
}
 0xb3a   :  { %1792 = dma.vmem_to_hbm [thread:$0]  %s1787_s4, 256, %s3068_s6, [#allocation15], %s2280_s9, %s2280_s9, %s2281_s10  }
 0xb3b   :  { %s2286_s26 = smov [#allocation13]  }
 0xb3c   :  { %s1774_s27 = sshll.u32 %s2286_s26, 4  ;;  %s1775_s27 = int_to_ptr.vmem [resolvable:$true] %s1774_s27 }
 0xb3d   :  { %s2245_s28 = scalar_lea.vmem %s1775_s27, 3072  ;;  %p2250_p3 = scmp.lt.s32.totalorder %s1775_s27, %s1775_s27 }
 0xb3e   :  { %p2246_p2 = scmp.ne.s32.totalorder %s1775_s27, %s2245_s28  ;;  %p2251_p4 = scmp.lt.s32.totalorder %s2245_s28, %s2245_s28 }
 0xb40   :  { %p2252_p5 = por %p2251_p4, %p2250_p3 }
 0xb42   :  { %p2253_p6 = pnand %p2252_p5, %p2246_p2 }
 0xbf8   :  { %v1936_v59 = vpop.f32.mrf.mxu0 }
 0xbf9   :  { %v1735_v20 = vadd.f32 %v1936_v59, %v3007_v49 }
 0xbfa   :  { %v1729_v24 = vpop.f32.mrf.mxu0 }
 0xbfb   :  { %1761 = vst [vmem:[#allocation13 + $0xb8] sm:$0xff] %v1735_v20  ;;  %v1730_v25 = vadd.f32 %v3007_v49, %v1729_v24 }
 0xbfd   :  { %1760 = vst [vmem:[#allocation13 + $0xb0] sm:$0xff] %v1730_v25 }
 0xbfe   :  { %2256 = shalt.err (!%p2253_p6)
}
 0xbff   :  { %1780 = dma.vmem_to_hbm [thread:$0]  %s1775_s27, 3072, %s3067_s5, [#allocation6], %s2280_s9, %s2280_s9, %s2281_s10  }
 0xc00   :  { %2271 = dma.done.wait [#allocation6], 3072  }
 0xc01   :  { %2272 = vsyncadd [#allocation6], 4294964224 }
 0xc02   :  { %2273 = dma.done.wait [#allocation15], 256  }
 0xc03   :  { %2274 = vsyncadd [#allocation15], 4294967040 }
 0xc04   :  { %1799 = vsyncpa [#allocation5], 1 }
 0xc05   :  { %1800 = vsyncpa [#allocation8], 1 }
 0xc06   :  { %1801 = vsyncpa [#allocation11], 1 }
 0xc07   :  { %1802 = vsyncpa [#allocation6], 1 }
 0xc08   :  { %1803 = vsyncpa [#allocation15], 1 }

</bundles_post_ra>
